<compile_context>
chip_gen: v7x
topology: tpu7x:2x2x1
jax: 0.10.0
libtpu: 0.0.40
codegen_flags: <defaults>
</compile_context>

<pallas_src>
import functools
import numpy as np
import jax
import jax.numpy as jnp
from jax.experimental import pallas as pl
from jax.experimental.pallas import tpu as pltpu


# ------------------ shared math helpers (kernel + references) -------------- #

def _quantize_weight_dorefa(w, w_bit):
    """DoReFa weight quantization (weight_quantize_fn in GAROS)."""
    n = float(2 ** w_bit - 1)
    wt = jnp.tanh(w)
    wq = wt / (2.0 * jnp.max(jnp.abs(wt))) + 0.5
    return 2.0 * (jnp.round(wq * n) / n) - 1.0


def _weight_to_tap_mat(w_oihw):
    """PyTorch (Cout,Cin,3,3) weight -> (Cout, 9*Cin), tap-major (kh,kw,cin)."""
    cout, cin = w_oihw.shape[0], w_oihw.shape[1]
    return jnp.transpose(w_oihw, (0, 2, 3, 1)).reshape(cout, 9 * cin)


def _conv_bn_act_block(x_l, w1m, w2m, g1, b1, g2, b2, mask,
                       *, n_img, planes, h, w, na):
    """Whole BasicBlock_Q forward on plane jnp arrays.

    Shared verbatim between the Pallas kernel body and the 'matched' JAX
    reference so the numerical check exercises only the Pallas plumbing.

    x_l : (N, C, L) f32  channels-on-sublanes, padded spatial grid + margins
          on the lane axis, L = (H+2)*(W+2) + 2*MARGIN
    w*m : (planes, 9*C) bf16 tap-major quantized conv weights
    g/b : (planes, 1) f32 BN affine params (column vectors)
    mask: (1, SP) f32, 1.0 at interior (valid) spatial lanes
    returns list of N arrays, each (planes, SP) f32 on the padded grid.
    """
    wp = w + 2
    sp = (h + 2) * wp
    margin = wp + 1
    inv_m = 1.0 / float(n_img * h * w)
    taps = [(kh - 1) * wp + (kw - 1) for kh in range(3) for kw in range(3)]

    def conv_taps(xq, wm):
        # Gather the 9 lane-shifted tap windows along the sublane (K) axis:
        # each (C, SP) bf16 piece is an aligned packed sublane group, so this
        # concat is vreg placement, not a cross-lane relayout.  One MXU dot.
        rhs = jnp.concatenate(
            [xq[:, margin + d: margin + d + sp] for d in taps], axis=0)
        return jnp.dot(wm, rhs, preferred_element_type=jnp.float32)

    def bn_scale_shift(accs, g, b):
        # Training-mode batch stats over the valid interior lanes of all
        # images (one-pass sum / sum-of-squares, biased variance).
        s = sum(jnp.sum(a * mask, axis=1, keepdims=True) for a in accs)
        sq = sum(jnp.sum(a * a * mask, axis=1, keepdims=True) for a in accs)
        mean = s * inv_m
        var = sq * inv_m - mean * mean
        scale = g * jax.lax.rsqrt(var + 1e-5)          # (planes, 1)
        return scale, b - mean * scale

    def act_q(y):
        return jnp.round(jnp.clip(y, 0.0, 1.0) * na) * (1.0 / na)

    # ---------------- stage 1: act1(bn1(conv1_q(x))) -----------------------
    acc1 = [conv_taps(x_l[i].astype(jnp.bfloat16), w1m) for i in range(n_img)]
    sc1, sh1 = bn_scale_shift(acc1, g1, b1)
    zmarg = jnp.zeros((planes, margin), jnp.bfloat16)
    o1 = []
    for i in range(n_img):
        # mask zeroes the spatial halo lanes (conv2's zero padding); the
        # intermediate stays in vregs as bf16 -- no f32 scratch round trip.
        q = act_q(acc1[i] * sc1 + sh1) * mask
        o1.append(jnp.concatenate([zmarg, q.astype(jnp.bfloat16), zmarg],
                                  axis=1))

    # --------- stage 2: act2(bn2(conv2_q(out1)) + identity shortcut) -------
    acc2 = [conv_taps(o1[i], w2m) for i in range(n_img)]
    sc2, sh2 = bn_scale_shift(acc2, g2, b2)
    outs = []
    for i in range(n_img):
        shortcut = x_l[i][:, margin:margin + sp]       # interior lane slice
        outs.append(act_q(acc2[i] * sc2 + sh2 + shortcut))
    return outs


# ------------------------------ Pallas kernel ------------------------------ #

def _make_fused_kernel(n_img, planes, h, w, a_bit):
    na = float(2 ** a_bit - 1)

    def kernel(x_ref, w1_ref, w2_ref, gb1_ref, gb2_ref, mask_ref, out_ref):
        gb1 = gb1_ref[...]
        gb2 = gb2_ref[...]
        outs = _conv_bn_act_block(
            x_ref[...], w1_ref[...], w2_ref[...],
            gb1[0], gb1[1], gb2[0], gb2[1], mask_ref[...],
            n_img=n_img, planes=planes, h=h, w=w, na=na)
        for i in range(n_img):
            out_ref[i] = outs[i]

    return kernel


# ------------------------------- wrappers ----------------------------------- #

def _prepare_operands(x_nchw, w1, g1, b1, w2, g2, b2, w_bit):
    """XLA prologue: weight quant + layout packing (runs once, outside kernel)."""
    n, c, h, w = x_nchw.shape
    planes = w1.shape[0]
    wp = w + 2
    sp = (h + 2) * wp
    margin = wp + 1

    # NCHW spatial zero-pad, flatten (h, w) into the lane axis and add a
    # MARGIN-lane slack on each side so every 3x3 tap is a static lane slice.
    xpad = jnp.pad(x_nchw.astype(jnp.float32), ((0, 0), (0, 0), (1, 1), (1, 1)))
    x_l = jnp.pad(xpad.reshape(n, c, sp), ((0, 0), (0, 0), (margin, margin)))

    w1m = _weight_to_tap_mat(_quantize_weight_dorefa(w1, w_bit)).astype(jnp.bfloat16)
    w2m = _weight_to_tap_mat(_quantize_weight_dorefa(w2, w_bit)).astype(jnp.bfloat16)

    gb1 = jnp.stack([g1, b1]).astype(jnp.float32).reshape(2, planes, 1)
    gb2 = jnp.stack([g2, b2]).astype(jnp.float32).reshape(2, planes, 1)

    pos = jnp.arange(sp)
    hh, ww = pos // wp, pos % wp
    mask = (((hh >= 1) & (hh <= h) & (ww >= 1) & (ww <= w))
            .astype(jnp.float32).reshape(1, sp))
    return x_l, w1m, w2m, gb1, gb2, mask


@functools.partial(jax.jit, static_argnames=("w_bit", "a_bit"))
def basic_block_q_forward(x_nchw, w1, g1, b1, w2, g2, b2, *, w_bit=4, a_bit=4):
    """BasicBlock_Q forward (stride=1, in_planes == planes).  I/O in NCHW."""
    n, c, h, w = x_nchw.shape
    planes = w1.shape[0]
    assert w1.shape == (planes, c, 3, 3) and w2.shape == (planes, planes, 3, 3)
    assert c == planes, "identity-shortcut configuration requires C == planes"
    wp, hp = w + 2, h + 2
    sp = hp * wp
    margin = wp + 1
    lane_len = sp + 2 * margin

    x_l, w1m, w2m, gb1, gb2, mask = _prepare_operands(
        x_nchw, w1, g1, b1, w2, g2, b2, w_bit)

    kernel = _make_fused_kernel(n, planes, h, w, a_bit)

    # Everything (inputs + intermediates) is ~150 KB, so grid=(1,) with fully
    # resident blocks is the right structure at these shapes; see the scaling
    # TODO in the module header for the M-tiled / two-pass-BN variant.
    out = pl.pallas_call(
        kernel,
        out_shape=jax.ShapeDtypeStruct((n, planes, sp), jnp.float32),
        grid=(1,),
        in_specs=[
            pl.BlockSpec((n, c, lane_len), lambda i: (0, 0, 0)),
            pl.BlockSpec((planes, 9 * c), lambda i: (0, 0)),
            pl.BlockSpec((planes, 9 * planes), lambda i: (0, 0)),
            pl.BlockSpec((2, planes, 1), lambda i: (0, 0, 0)),
            pl.BlockSpec((2, planes, 1), lambda i: (0, 0, 0)),
            pl.BlockSpec((1, sp), lambda i: (0, 0)),
        ],
        out_specs=pl.BlockSpec((n, planes, sp), lambda i: (0, 0, 0)),
        compiler_params=pltpu.CompilerParams(
            dimension_semantics=("arbitrary",)),
    )(x_l, w1m, w2m, gb1, gb2, mask)

    # crop the padded spatial grid -> already NCHW
    return out.reshape(n, planes, hp, wp)[:, :, 1:h + 1, 1:w + 1]


# ------------------------------ references --------------------------------- #

@functools.partial(jax.jit, static_argnames=("w_bit", "a_bit"))
def _reference_matched(x_nchw, w1, g1, b1, w2, g2, b2, *, w_bit, a_bit):
    """Runs the exact same math (same prologue + shared block function) through
    plain XLA, so the comparison isolates the Pallas plumbing."""
    n, c, h, w = x_nchw.shape
    planes = w1.shape[0]
    na = float(2 ** a_bit - 1)
    wp, hp = w + 2, h + 2
    x_l, w1m, w2m, gb1, gb2, mask = _prepare_operands(
        x_nchw, w1, g1, b1, w2, g2, b2, w_bit)
    outs = _conv_bn_act_block(
        x_l, w1m, w2m, gb1[0], gb1[1], gb2[0], gb2[1], mask,
        n_img=n, planes=planes, h=h, w=w, na=na)
    out = jnp.stack(outs, axis=0)
    return out.reshape(n, planes, hp, wp)[:, :, 1:h + 1, 1:w + 1]


@functools.partial(jax.jit, static_argnames=("w_bit", "a_bit"))
def _reference_f32(x_nchw, w1, g1, b1, w2, g2, b2, *, w_bit, a_bit):
    """Exact PyTorch-semantics reference (f32 convs)."""
    na = float(2 ** a_bit - 1)

    def conv(x, wgt):
        return jax.lax.conv_general_dilated(
            x, wgt, (1, 1), ((1, 1), (1, 1)),
            dimension_numbers=("NCHW", "OIHW", "NCHW"))

    def bn(y, g, b):
        m = jnp.mean(y, axis=(0, 2, 3), keepdims=True)
        v = jnp.mean((y - m) ** 2, axis=(0, 2, 3), keepdims=True)
        return (y - m) * jax.lax.rsqrt(v + 1e-5) * g.reshape(1, -1, 1, 1) \
            + b.reshape(1, -1, 1, 1)

    def act(y):
        return jnp.round(jnp.clip(y, 0.0, 1.0) * na) / na

    out = act(bn(conv(x_nchw, _quantize_weight_dorefa(w1, w_bit)), g1, b1))
    out = bn(conv(out, _quantize_weight_dorefa(w2, w_bit)), g2, b2)
    out = out + x_nchw
    return act(out)


# ---------------------------------- main ------------------------------------ #

if __name__ == "__main__":
    W_BIT, A_BIT = 4, 4
    N, C, H, W = 2, 16, 16, 16      # batch=2, in_planes=planes=16, spatial=16
    planes = C

    key = jax.random.PRNGKey(0)
    k = jax.random.split(key, 7)
    x = jax.random.normal(k[0], (N, C, H, W), jnp.float32)
    w1 = 0.1 * jax.random.normal(k[1], (planes, C, 3, 3), jnp.float32)
    w2 = 0.1 * jax.random.normal(k[2], (planes, planes, 3, 3), jnp.float32)
    g1 = 1.0 + 0.1 * jax.random.normal(k[3], (planes,), jnp.float32)
    b1 = 0.1 * jax.random.normal(k[4], (planes,), jnp.float32)
    g2 = 1.0 + 0.1 * jax.random.normal(k[5], (planes,), jnp.float32)
    b2 = 0.1 * jax.random.normal(k[6], (planes,), jnp.float32)

    out = jax.block_until_ready(
        basic_block_q_forward(x, w1, g1, b1, w2, g2, b2,
                              w_bit=W_BIT, a_bit=A_BIT))

    ref_match = jax.block_until_ready(
        _reference_matched(x, w1, g1, b1, w2, g2, b2, w_bit=W_BIT, a_bit=A_BIT))
    ref_f32 = jax.block_until_ready(
        _reference_f32(x, w1, g1, b1, w2, g2, b2, w_bit=W_BIT, a_bit=A_BIT))

    out_np = np.asarray(out)
    step = 1.0 / (2 ** A_BIT - 1)
    d_m = np.abs(out_np - np.asarray(ref_match))   # matched (same math) ref
    d_f = np.abs(out_np - np.asarray(ref_f32))     # exact f32 reference

    assert out.shape == (N, planes, H, W)
    # tight check vs. the reference that runs the identical bf16/f32 math
    assert float(d_m.mean()) < 2e-3, f"matched-ref mean diff {d_m.mean()}"
    assert float(d_m.max()) <= step + 1e-4, f"matched-ref max diff {d_m.max()}"
    # semantic check vs. the exact f32 PyTorch-style reference: bf16 matmul
    # operands can flip values sitting on an activation-quant rounding edge by
    # one quantization step, so allow a small fraction of 1-step differences.
    assert float(d_f.mean()) < 2e-2, f"f32-ref mean diff {d_f.mean()}"
    assert float((d_f <= step + 1e-4).mean()) >= 0.999, \
        "too many >1-quant-step diffs vs f32 reference"

    print("KERNEL_OK")
</pallas_src>

<mosaic_0001>
module attributes {stable_mosaic.version = 11 : i64} {
  func.func @kernel(%arg0: i32, %arg1: memref<2x16x362xf32, #tpu.memory_space<vmem>>, %arg2: memref<16x144xbf16, #tpu.memory_space<vmem>>, %arg3: memref<16x144xbf16, #tpu.memory_space<vmem>>, %arg4: memref<2x16x1xf32, #tpu.memory_space<vmem>>, %arg5: memref<2x16x1xf32, #tpu.memory_space<vmem>>, %arg6: memref<1x324xf32, #tpu.memory_space<vmem>>, %arg7: memref<2x16x324xf32, #tpu.memory_space<vmem>>) attributes {dimension_semantics = [#tpu.dimension_semantics<arbitrary>], iteration_bounds = array<i64: 1>, scalar_prefetch = 0 : i64, scratch_operands = 0 : i64, tpu.core_type = #tpu.core_type<tc>, window_params = [{pipeline_mode = #tpu.pipeline_mode<synchronous>, transform_indices = @transform_0, window_bounds = array<i64: 2, 16, 362>}, {pipeline_mode = #tpu.pipeline_mode<synchronous>, transform_indices = @transform_1, window_bounds = array<i64: 16, 144>}, {pipeline_mode = #tpu.pipeline_mode<synchronous>, transform_indices = @transform_2, window_bounds = array<i64: 16, 144>}, {pipeline_mode = #tpu.pipeline_mode<synchronous>, transform_indices = @transform_3, window_bounds = array<i64: 2, 16, 1>}, {pipeline_mode = #tpu.pipeline_mode<synchronous>, transform_indices = @transform_4, window_bounds = array<i64: 2, 16, 1>}, {pipeline_mode = #tpu.pipeline_mode<synchronous>, transform_indices = @transform_5, window_bounds = array<i64: 1, 324>}, {pipeline_mode = #tpu.pipeline_mode<synchronous>, transform_indices = @transform_6, window_bounds = array<i64: 2, 16, 324>}]} {
    %c0 = arith.constant 0 : index
    %c0_0 = arith.constant 0 : index
    %c0_1 = arith.constant 0 : index
    %0 = vector.load %arg4[%c0, %c0_0, %c0_1] : memref<2x16x1xf32, #tpu.memory_space<vmem>>, vector<2x16x1xf32>
    %c0_2 = arith.constant 0 : index
    %c0_3 = arith.constant 0 : index
    %c0_4 = arith.constant 0 : index
    %1 = vector.load %arg5[%c0_2, %c0_3, %c0_4] : memref<2x16x1xf32, #tpu.memory_space<vmem>>, vector<2x16x1xf32>
    %c0_5 = arith.constant 0 : index
    %c0_6 = arith.constant 0 : index
    %c0_7 = arith.constant 0 : index
    %2 = vector.load %arg1[%c0_5, %c0_6, %c0_7] : memref<2x16x362xf32, #tpu.memory_space<vmem>>, vector<2x16x362xf32>
    %c0_8 = arith.constant 0 : index
    %c0_9 = arith.constant 0 : index
    %3 = vector.load %arg2[%c0_8, %c0_9] : memref<16x144xbf16, #tpu.memory_space<vmem>>, vector<16x144xbf16>
    %c0_10 = arith.constant 0 : index
    %c0_11 = arith.constant 0 : index
    %4 = vector.load %arg3[%c0_10, %c0_11] : memref<16x144xbf16, #tpu.memory_space<vmem>>, vector<16x144xbf16>
    %5 = vector.extract_strided_slice %0 {offsets = [0, 0, 0], sizes = [1, 16, 1], strides = [1, 1, 1]} : vector<2x16x1xf32> to vector<1x16x1xf32>
    %6 = vector.shape_cast %5 : vector<1x16x1xf32> to vector<16x1xf32>
    %7 = vector.extract_strided_slice %0 {offsets = [1, 0, 0], sizes = [1, 16, 1], strides = [1, 1, 1]} : vector<2x16x1xf32> to vector<1x16x1xf32>
    %8 = vector.shape_cast %7 : vector<1x16x1xf32> to vector<16x1xf32>
    %9 = vector.extract_strided_slice %1 {offsets = [0, 0, 0], sizes = [1, 16, 1], strides = [1, 1, 1]} : vector<2x16x1xf32> to vector<1x16x1xf32>
    %10 = vector.shape_cast %9 : vector<1x16x1xf32> to vector<16x1xf32>
    %11 = vector.extract_strided_slice %1 {offsets = [1, 0, 0], sizes = [1, 16, 1], strides = [1, 1, 1]} : vector<2x16x1xf32> to vector<1x16x1xf32>
    %12 = vector.shape_cast %11 : vector<1x16x1xf32> to vector<16x1xf32>
    %c0_12 = arith.constant 0 : index
    %c0_13 = arith.constant 0 : index
    %13 = vector.load %arg6[%c0_12, %c0_13] : memref<1x324xf32, #tpu.memory_space<vmem>>, vector<1x324xf32>
    %14 = vector.extract_strided_slice %2 {offsets = [0, 0, 0], sizes = [1, 16, 362], strides = [1, 1, 1]} : vector<2x16x362xf32> to vector<1x16x362xf32>
    %15 = vector.shape_cast %14 : vector<1x16x362xf32> to vector<16x362xf32>
    %16 = arith.truncf %15 : vector<16x362xf32> to vector<16x362xbf16>
    %17 = vector.extract_strided_slice %16 {offsets = [0, 0], sizes = [16, 324], strides = [1, 1]} : vector<16x362xbf16> to vector<16x324xbf16>
    %18 = vector.extract_strided_slice %16 {offsets = [0, 1], sizes = [16, 324], strides = [1, 1]} : vector<16x362xbf16> to vector<16x324xbf16>
    %19 = vector.extract_strided_slice %16 {offsets = [0, 2], sizes = [16, 324], strides = [1, 1]} : vector<16x362xbf16> to vector<16x324xbf16>
    %20 = vector.extract_strided_slice %16 {offsets = [0, 18], sizes = [16, 324], strides = [1, 1]} : vector<16x362xbf16> to vector<16x324xbf16>
    %21 = vector.extract_strided_slice %16 {offsets = [0, 19], sizes = [16, 324], strides = [1, 1]} : vector<16x362xbf16> to vector<16x324xbf16>
    %22 = vector.extract_strided_slice %16 {offsets = [0, 20], sizes = [16, 324], strides = [1, 1]} : vector<16x362xbf16> to vector<16x324xbf16>
    %23 = vector.extract_strided_slice %16 {offsets = [0, 36], sizes = [16, 324], strides = [1, 1]} : vector<16x362xbf16> to vector<16x324xbf16>
    %24 = vector.extract_strided_slice %16 {offsets = [0, 37], sizes = [16, 324], strides = [1, 1]} : vector<16x362xbf16> to vector<16x324xbf16>
    %25 = vector.extract_strided_slice %16 {offsets = [0, 38], sizes = [16, 324], strides = [1, 1]} : vector<16x362xbf16> to vector<16x324xbf16>
    %26 = tpu.concatenate %17, %18, %19, %20, %21, %22, %23, %24, %25 in 0 : vector<16x324xbf16>, vector<16x324xbf16>, vector<16x324xbf16>, vector<16x324xbf16>, vector<16x324xbf16>, vector<16x324xbf16>, vector<16x324xbf16>, vector<16x324xbf16>, vector<16x324xbf16> -> vector<144x324xbf16>
    %cst = arith.constant dense<0.000000e+00> : vector<16x324xf32>
    %27 = tpu.matmul %3, %26, %cst {dimension_numbers = #tpu.dot_dimension_numbers<[1], [0], [0], [1], [0, 0, 1, 1], [], []>} : vector<16x144xbf16>, vector<144x324xbf16>, vector<16x324xf32> -> vector<16x324xf32>
    %28 = vector.extract_strided_slice %2 {offsets = [1, 0, 0], sizes = [1, 16, 362], strides = [1, 1, 1]} : vector<2x16x362xf32> to vector<1x16x362xf32>
    %29 = vector.shape_cast %28 : vector<1x16x362xf32> to vector<16x362xf32>
    %30 = arith.truncf %29 : vector<16x362xf32> to vector<16x362xbf16>
    %31 = vector.extract_strided_slice %30 {offsets = [0, 0], sizes = [16, 324], strides = [1, 1]} : vector<16x362xbf16> to vector<16x324xbf16>
    %32 = vector.extract_strided_slice %30 {offsets = [0, 1], sizes = [16, 324], strides = [1, 1]} : vector<16x362xbf16> to vector<16x324xbf16>
    %33 = vector.extract_strided_slice %30 {offsets = [0, 2], sizes = [16, 324], strides = [1, 1]} : vector<16x362xbf16> to vector<16x324xbf16>
    %34 = vector.extract_strided_slice %30 {offsets = [0, 18], sizes = [16, 324], strides = [1, 1]} : vector<16x362xbf16> to vector<16x324xbf16>
    %35 = vector.extract_strided_slice %30 {offsets = [0, 19], sizes = [16, 324], strides = [1, 1]} : vector<16x362xbf16> to vector<16x324xbf16>
    %36 = vector.extract_strided_slice %30 {offsets = [0, 20], sizes = [16, 324], strides = [1, 1]} : vector<16x362xbf16> to vector<16x324xbf16>
    %37 = vector.extract_strided_slice %30 {offsets = [0, 36], sizes = [16, 324], strides = [1, 1]} : vector<16x362xbf16> to vector<16x324xbf16>
    %38 = vector.extract_strided_slice %30 {offsets = [0, 37], sizes = [16, 324], strides = [1, 1]} : vector<16x362xbf16> to vector<16x324xbf16>
    %39 = vector.extract_strided_slice %30 {offsets = [0, 38], sizes = [16, 324], strides = [1, 1]} : vector<16x362xbf16> to vector<16x324xbf16>
    %40 = tpu.concatenate %31, %32, %33, %34, %35, %36, %37, %38, %39 in 0 : vector<16x324xbf16>, vector<16x324xbf16>, vector<16x324xbf16>, vector<16x324xbf16>, vector<16x324xbf16>, vector<16x324xbf16>, vector<16x324xbf16>, vector<16x324xbf16>, vector<16x324xbf16> -> vector<144x324xbf16>
    %cst_14 = arith.constant dense<0.000000e+00> : vector<16x324xf32>
    %41 = tpu.matmul %3, %40, %cst_14 {dimension_numbers = #tpu.dot_dimension_numbers<[1], [0], [0], [1], [0, 0, 1, 1], [], []>} : vector<16x144xbf16>, vector<144x324xbf16>, vector<16x324xf32> -> vector<16x324xf32>
    %42 = vector.broadcast %13 : vector<1x324xf32> to vector<16x324xf32>
    %43 = arith.mulf %27, %42 : vector<16x324xf32>
    %cst_15 = arith.constant dense<0.000000e+00> : vector<16xf32>
    %44 = vector.multi_reduction <add>, %43, %cst_15 [1] : vector<16x324xf32> to vector<16xf32>
    %45 = vector.shape_cast %44 : vector<16xf32> to vector<16x1xf32>
    %cst_16 = arith.constant 0.000000e+00 : f32
    %46 = vector.broadcast %cst_16 : f32 to vector<16x1xf32>
    %47 = arith.addf %46, %45 : vector<16x1xf32>
    %48 = vector.broadcast %13 : vector<1x324xf32> to vector<16x324xf32>
    %49 = arith.mulf %41, %48 : vector<16x324xf32>
    %cst_17 = arith.constant dense<0.000000e+00> : vector<16xf32>
    %50 = vector.multi_reduction <add>, %49, %cst_17 [1] : vector<16x324xf32> to vector<16xf32>
    %51 = vector.shape_cast %50 : vector<16xf32> to vector<16x1xf32>
    %52 = arith.addf %47, %51 : vector<16x1xf32>
    %53 = arith.mulf %27, %27 : vector<16x324xf32>
    %54 = vector.broadcast %13 : vector<1x324xf32> to vector<16x324xf32>
    %55 = arith.mulf %53, %54 : vector<16x324xf32>
    %cst_18 = arith.constant dense<0.000000e+00> : vector<16xf32>
    %56 = vector.multi_reduction <add>, %55, %cst_18 [1] : vector<16x324xf32> to vector<16xf32>
    %57 = vector.shape_cast %56 : vector<16xf32> to vector<16x1xf32>
    %cst_19 = arith.constant 0.000000e+00 : f32
    %58 = vector.broadcast %cst_19 : f32 to vector<16x1xf32>
    %59 = arith.addf %58, %57 : vector<16x1xf32>
    %60 = arith.mulf %41, %41 : vector<16x324xf32>
    %61 = vector.broadcast %13 : vector<1x324xf32> to vector<16x324xf32>
    %62 = arith.mulf %60, %61 : vector<16x324xf32>
    %cst_20 = arith.constant dense<0.000000e+00> : vector<16xf32>
    %63 = vector.multi_reduction <add>, %62, %cst_20 [1] : vector<16x324xf32> to vector<16xf32>
    %64 = vector.shape_cast %63 : vector<16xf32> to vector<16x1xf32>
    %65 = arith.addf %59, %64 : vector<16x1xf32>
    %cst_21 = arith.constant 0.001953125 : f32
    %66 = vector.broadcast %cst_21 : f32 to vector<16x1xf32>
    %67 = arith.mulf %52, %66 : vector<16x1xf32>
    %cst_22 = arith.constant 0.001953125 : f32
    %68 = vector.broadcast %cst_22 : f32 to vector<16x1xf32>
    %69 = arith.mulf %65, %68 : vector<16x1xf32>
    %70 = arith.mulf %67, %67 : vector<16x1xf32>
    %71 = arith.subf %69, %70 : vector<16x1xf32>
    %cst_23 = arith.constant 9.99999974E-6 : f32
    %72 = vector.broadcast %cst_23 : f32 to vector<16x1xf32>
    %73 = arith.addf %71, %72 : vector<16x1xf32>
    %74 = math.rsqrt %73 : vector<16x1xf32>
    %75 = arith.mulf %6, %74 : vector<16x1xf32>
    %76 = arith.mulf %67, %75 : vector<16x1xf32>
    %77 = arith.subf %8, %76 : vector<16x1xf32>
    %cst_24 = arith.constant 0.000000e+00 : bf16
    %78 = vector.broadcast %cst_24 : bf16 to vector<16x19xbf16>
    %79 = vector.broadcast %75 : vector<16x1xf32> to vector<16x324xf32>
    %80 = arith.mulf %27, %79 : vector<16x324xf32>
    %81 = vector.broadcast %77 : vector<16x1xf32> to vector<16x324xf32>
    %82 = arith.addf %80, %81 : vector<16x324xf32>
    %cst_25 = arith.constant 0.000000e+00 : f32
    %cst_26 = arith.constant 1.000000e+00 : f32
    %83 = vector.broadcast %cst_25 : f32 to vector<16x324xf32>
    %84 = arith.maximumf %83, %82 : vector<16x324xf32>
    %85 = vector.broadcast %cst_26 : f32 to vector<16x324xf32>
    %86 = arith.minimumf %85, %84 : vector<16x324xf32>
    %cst_27 = arith.constant 1.500000e+01 : f32
    %87 = vector.broadcast %cst_27 : f32 to vector<16x324xf32>
    %88 = arith.mulf %86, %87 : vector<16x324xf32>
    %89 = math.roundeven %88 : vector<16x324xf32>
    %cst_28 = arith.constant 0.0666666701 : f32
    %90 = vector.broadcast %cst_28 : f32 to vector<16x324xf32>
    %91 = arith.mulf %89, %90 : vector<16x324xf32>
    %92 = vector.broadcast %13 : vector<1x324xf32> to vector<16x324xf32>
    %93 = arith.mulf %91, %92 : vector<16x324xf32>
    %94 = arith.truncf %93 : vector<16x324xf32> to vector<16x324xbf16>
    %95 = tpu.concatenate %78, %94, %78 in 1 : vector<16x19xbf16>, vector<16x324xbf16>, vector<16x19xbf16> -> vector<16x362xbf16>
    %96 = vector.broadcast %75 : vector<16x1xf32> to vector<16x324xf32>
    %97 = arith.mulf %41, %96 : vector<16x324xf32>
    %98 = vector.broadcast %77 : vector<16x1xf32> to vector<16x324xf32>
    %99 = arith.addf %97, %98 : vector<16x324xf32>
    %cst_29 = arith.constant 0.000000e+00 : f32
    %cst_30 = arith.constant 1.000000e+00 : f32
    %100 = vector.broadcast %cst_29 : f32 to vector<16x324xf32>
    %101 = arith.maximumf %100, %99 : vector<16x324xf32>
    %102 = vector.broadcast %cst_30 : f32 to vector<16x324xf32>
    %103 = arith.minimumf %102, %101 : vector<16x324xf32>
    %cst_31 = arith.constant 1.500000e+01 : f32
    %104 = vector.broadcast %cst_31 : f32 to vector<16x324xf32>
    %105 = arith.mulf %103, %104 : vector<16x324xf32>
    %106 = math.roundeven %105 : vector<16x324xf32>
    %cst_32 = arith.constant 0.0666666701 : f32
    %107 = vector.broadcast %cst_32 : f32 to vector<16x324xf32>
    %108 = arith.mulf %106, %107 : vector<16x324xf32>
    %109 = vector.broadcast %13 : vector<1x324xf32> to vector<16x324xf32>
    %110 = arith.mulf %108, %109 : vector<16x324xf32>
    %111 = arith.truncf %110 : vector<16x324xf32> to vector<16x324xbf16>
    %112 = tpu.concatenate %78, %111, %78 in 1 : vector<16x19xbf16>, vector<16x324xbf16>, vector<16x19xbf16> -> vector<16x362xbf16>
    %113 = vector.extract_strided_slice %95 {offsets = [0, 0], sizes = [16, 324], strides = [1, 1]} : vector<16x362xbf16> to vector<16x324xbf16>
    %114 = vector.extract_strided_slice %95 {offsets = [0, 1], sizes = [16, 324], strides = [1, 1]} : vector<16x362xbf16> to vector<16x324xbf16>
    %115 = vector.extract_strided_slice %95 {offsets = [0, 2], sizes = [16, 324], strides = [1, 1]} : vector<16x362xbf16> to vector<16x324xbf16>
    %116 = vector.extract_strided_slice %95 {offsets = [0, 18], sizes = [16, 324], strides = [1, 1]} : vector<16x362xbf16> to vector<16x324xbf16>
    %117 = vector.extract_strided_slice %95 {offsets = [0, 19], sizes = [16, 324], strides = [1, 1]} : vector<16x362xbf16> to vector<16x324xbf16>
    %118 = vector.extract_strided_slice %95 {offsets = [0, 20], sizes = [16, 324], strides = [1, 1]} : vector<16x362xbf16> to vector<16x324xbf16>
    %119 = vector.extract_strided_slice %95 {offsets = [0, 36], sizes = [16, 324], strides = [1, 1]} : vector<16x362xbf16> to vector<16x324xbf16>
    %120 = vector.extract_strided_slice %95 {offsets = [0, 37], sizes = [16, 324], strides = [1, 1]} : vector<16x362xbf16> to vector<16x324xbf16>
    %121 = vector.extract_strided_slice %95 {offsets = [0, 38], sizes = [16, 324], strides = [1, 1]} : vector<16x362xbf16> to vector<16x324xbf16>
    %122 = tpu.concatenate %113, %114, %115, %116, %117, %118, %119, %120, %121 in 0 : vector<16x324xbf16>, vector<16x324xbf16>, vector<16x324xbf16>, vector<16x324xbf16>, vector<16x324xbf16>, vector<16x324xbf16>, vector<16x324xbf16>, vector<16x324xbf16>, vector<16x324xbf16> -> vector<144x324xbf16>
    %cst_33 = arith.constant dense<0.000000e+00> : vector<16x324xf32>
    %123 = tpu.matmul %4, %122, %cst_33 {dimension_numbers = #tpu.dot_dimension_numbers<[1], [0], [0], [1], [0, 0, 1, 1], [], []>} : vector<16x144xbf16>, vector<144x324xbf16>, vector<16x324xf32> -> vector<16x324xf32>
    %124 = vector.extract_strided_slice %112 {offsets = [0, 0], sizes = [16, 324], strides = [1, 1]} : vector<16x362xbf16> to vector<16x324xbf16>
    %125 = vector.extract_strided_slice %112 {offsets = [0, 1], sizes = [16, 324], strides = [1, 1]} : vector<16x362xbf16> to vector<16x324xbf16>
    %126 = vector.extract_strided_slice %112 {offsets = [0, 2], sizes = [16, 324], strides = [1, 1]} : vector<16x362xbf16> to vector<16x324xbf16>
    %127 = vector.extract_strided_slice %112 {offsets = [0, 18], sizes = [16, 324], strides = [1, 1]} : vector<16x362xbf16> to vector<16x324xbf16>
    %128 = vector.extract_strided_slice %112 {offsets = [0, 19], sizes = [16, 324], strides = [1, 1]} : vector<16x362xbf16> to vector<16x324xbf16>
    %129 = vector.extract_strided_slice %112 {offsets = [0, 20], sizes = [16, 324], strides = [1, 1]} : vector<16x362xbf16> to vector<16x324xbf16>
    %130 = vector.extract_strided_slice %112 {offsets = [0, 36], sizes = [16, 324], strides = [1, 1]} : vector<16x362xbf16> to vector<16x324xbf16>
    %131 = vector.extract_strided_slice %112 {offsets = [0, 37], sizes = [16, 324], strides = [1, 1]} : vector<16x362xbf16> to vector<16x324xbf16>
    %132 = vector.extract_strided_slice %112 {offsets = [0, 38], sizes = [16, 324], strides = [1, 1]} : vector<16x362xbf16> to vector<16x324xbf16>
    %133 = tpu.concatenate %124, %125, %126, %127, %128, %129, %130, %131, %132 in 0 : vector<16x324xbf16>, vector<16x324xbf16>, vector<16x324xbf16>, vector<16x324xbf16>, vector<16x324xbf16>, vector<16x324xbf16>, vector<16x324xbf16>, vector<16x324xbf16>, vector<16x324xbf16> -> vector<144x324xbf16>
    %cst_34 = arith.constant dense<0.000000e+00> : vector<16x324xf32>
    %134 = tpu.matmul %4, %133, %cst_34 {dimension_numbers = #tpu.dot_dimension_numbers<[1], [0], [0], [1], [0, 0, 1, 1], [], []>} : vector<16x144xbf16>, vector<144x324xbf16>, vector<16x324xf32> -> vector<16x324xf32>
    %135 = vector.broadcast %13 : vector<1x324xf32> to vector<16x324xf32>
    %136 = arith.mulf %123, %135 : vector<16x324xf32>
    %cst_35 = arith.constant dense<0.000000e+00> : vector<16xf32>
    %137 = vector.multi_reduction <add>, %136, %cst_35 [1] : vector<16x324xf32> to vector<16xf32>
    %138 = vector.shape_cast %137 : vector<16xf32> to vector<16x1xf32>
    %cst_36 = arith.constant 0.000000e+00 : f32
    %139 = vector.broadcast %cst_36 : f32 to vector<16x1xf32>
    %140 = arith.addf %139, %138 : vector<16x1xf32>
    %141 = vector.broadcast %13 : vector<1x324xf32> to vector<16x324xf32>
    %142 = arith.mulf %134, %141 : vector<16x324xf32>
    %cst_37 = arith.constant dense<0.000000e+00> : vector<16xf32>
    %143 = vector.multi_reduction <add>, %142, %cst_37 [1] : vector<16x324xf32> to vector<16xf32>
    %144 = vector.shape_cast %143 : vector<16xf32> to vector<16x1xf32>
    %145 = arith.addf %140, %144 : vector<16x1xf32>
    %146 = arith.mulf %123, %123 : vector<16x324xf32>
    %147 = vector.broadcast %13 : vector<1x324xf32> to vector<16x324xf32>
    %148 = arith.mulf %146, %147 : vector<16x324xf32>
    %cst_38 = arith.constant dense<0.000000e+00> : vector<16xf32>
    %149 = vector.multi_reduction <add>, %148, %cst_38 [1] : vector<16x324xf32> to vector<16xf32>
    %150 = vector.shape_cast %149 : vector<16xf32> to vector<16x1xf32>
    %cst_39 = arith.constant 0.000000e+00 : f32
    %151 = vector.broadcast %cst_39 : f32 to vector<16x1xf32>
    %152 = arith.addf %151, %150 : vector<16x1xf32>
    %153 = arith.mulf %134, %134 : vector<16x324xf32>
    %154 = vector.broadcast %13 : vector<1x324xf32> to vector<16x324xf32>
    %155 = arith.mulf %153, %154 : vector<16x324xf32>
    %cst_40 = arith.constant dense<0.000000e+00> : vector<16xf32>
    %156 = vector.multi_reduction <add>, %155, %cst_40 [1] : vector<16x324xf32> to vector<16xf32>
    %157 = vector.shape_cast %156 : vector<16xf32> to vector<16x1xf32>
    %158 = arith.addf %152, %157 : vector<16x1xf32>
    %cst_41 = arith.constant 0.001953125 : f32
    %159 = vector.broadcast %cst_41 : f32 to vector<16x1xf32>
    %160 = arith.mulf %145, %159 : vector<16x1xf32>
    %cst_42 = arith.constant 0.001953125 : f32
    %161 = vector.broadcast %cst_42 : f32 to vector<16x1xf32>
    %162 = arith.mulf %158, %161 : vector<16x1xf32>
    %163 = arith.mulf %160, %160 : vector<16x1xf32>
    %164 = arith.subf %162, %163 : vector<16x1xf32>
    %cst_43 = arith.constant 9.99999974E-6 : f32
    %165 = vector.broadcast %cst_43 : f32 to vector<16x1xf32>
    %166 = arith.addf %164, %165 : vector<16x1xf32>
    %167 = math.rsqrt %166 : vector<16x1xf32>
    %168 = arith.mulf %10, %167 : vector<16x1xf32>
    %169 = arith.mulf %160, %168 : vector<16x1xf32>
    %170 = arith.subf %12, %169 : vector<16x1xf32>
    %171 = vector.extract_strided_slice %2 {offsets = [0, 0, 0], sizes = [1, 16, 362], strides = [1, 1, 1]} : vector<2x16x362xf32> to vector<1x16x362xf32>
    %172 = vector.shape_cast %171 : vector<1x16x362xf32> to vector<16x362xf32>
    %173 = vector.extract_strided_slice %172 {offsets = [0, 19], sizes = [16, 324], strides = [1, 1]} : vector<16x362xf32> to vector<16x324xf32>
    %174 = vector.broadcast %168 : vector<16x1xf32> to vector<16x324xf32>
    %175 = arith.mulf %123, %174 : vector<16x324xf32>
    %176 = vector.broadcast %170 : vector<16x1xf32> to vector<16x324xf32>
    %177 = arith.addf %175, %176 : vector<16x324xf32>
    %178 = arith.addf %177, %173 : vector<16x324xf32>
    %cst_44 = arith.constant 0.000000e+00 : f32
    %cst_45 = arith.constant 1.000000e+00 : f32
    %179 = vector.broadcast %cst_44 : f32 to vector<16x324xf32>
    %180 = arith.maximumf %179, %178 : vector<16x324xf32>
    %181 = vector.broadcast %cst_45 : f32 to vector<16x324xf32>
    %182 = arith.minimumf %181, %180 : vector<16x324xf32>
    %cst_46 = arith.constant 1.500000e+01 : f32
    %183 = vector.broadcast %cst_46 : f32 to vector<16x324xf32>
    %184 = arith.mulf %182, %183 : vector<16x324xf32>
    %185 = math.roundeven %184 : vector<16x324xf32>
    %cst_47 = arith.constant 0.0666666701 : f32
    %186 = vector.broadcast %cst_47 : f32 to vector<16x324xf32>
    %187 = arith.mulf %185, %186 : vector<16x324xf32>
    %188 = vector.extract_strided_slice %2 {offsets = [1, 0, 0], sizes = [1, 16, 362], strides = [1, 1, 1]} : vector<2x16x362xf32> to vector<1x16x362xf32>
    %189 = vector.shape_cast %188 : vector<1x16x362xf32> to vector<16x362xf32>
    %190 = vector.extract_strided_slice %189 {offsets = [0, 19], sizes = [16, 324], strides = [1, 1]} : vector<16x362xf32> to vector<16x324xf32>
    %191 = vector.broadcast %168 : vector<16x1xf32> to vector<16x324xf32>
    %192 = arith.mulf %134, %191 : vector<16x324xf32>
    %193 = vector.broadcast %170 : vector<16x1xf32> to vector<16x324xf32>
    %194 = arith.addf %192, %193 : vector<16x324xf32>
    %195 = arith.addf %194, %190 : vector<16x324xf32>
    %cst_48 = arith.constant 0.000000e+00 : f32
    %cst_49 = arith.constant 1.000000e+00 : f32
    %196 = vector.broadcast %cst_48 : f32 to vector<16x324xf32>
    %197 = arith.maximumf %196, %195 : vector<16x324xf32>
    %198 = vector.broadcast %cst_49 : f32 to vector<16x324xf32>
    %199 = arith.minimumf %198, %197 : vector<16x324xf32>
    %cst_50 = arith.constant 1.500000e+01 : f32
    %200 = vector.broadcast %cst_50 : f32 to vector<16x324xf32>
    %201 = arith.mulf %199, %200 : vector<16x324xf32>
    %202 = math.roundeven %201 : vector<16x324xf32>
    %cst_51 = arith.constant 0.0666666701 : f32
    %203 = vector.broadcast %cst_51 : f32 to vector<16x324xf32>
    %204 = arith.mulf %202, %203 : vector<16x324xf32>
    %c0_52 = arith.constant 0 : index
    %c0_53 = arith.constant 0 : index
    %c0_54 = arith.constant 0 : index
    %205 = vector.load %arg7[%c0_52, %c0_53, %c0_54] : memref<2x16x324xf32, #tpu.memory_space<vmem>>, vector<1x16x324xf32>
    %206 = vector.shape_cast %205 : vector<1x16x324xf32> to vector<16x324xf32>
    %207 = vector.shape_cast %187 : vector<16x324xf32> to vector<1x16x324xf32>
    tpu.vector_store %arg7[%c0_52, %c0_53, %c0_54], %207 {strides = array<i32>} : memref<2x16x324xf32, #tpu.memory_space<vmem>>, vector<1x16x324xf32>,
    %c1 = arith.constant 1 : index
    %c0_55 = arith.constant 0 : index
    %c0_56 = arith.constant 0 : index
    %208 = vector.load %arg7[%c1, %c0_55, %c0_56] : memref<2x16x324xf32, #tpu.memory_space<vmem>>, vector<1x16x324xf32>
    %209 = vector.shape_cast %208 : vector<1x16x324xf32> to vector<16x324xf32>
    %210 = vector.shape_cast %204 : vector<16x324xf32> to vector<1x16x324xf32>
    tpu.vector_store %arg7[%c1, %c0_55, %c0_56], %210 {strides = array<i32>} : memref<2x16x324xf32, #tpu.memory_space<vmem>>, vector<1x16x324xf32>,
    return
  }
  func.func @transform_0(%arg0: i32) -> (i32, i32, i32) {
    %c0_i32 = arith.constant 0 : i32
    %c0_i32_0 = arith.constant 0 : i32
    %c0_i32_1 = arith.constant 0 : i32
    %c0_i32_2 = arith.constant 0 : i32
    return %c0_i32, %c0_i32_0, %c0_i32_1 : i32, i32, i32
  }
  func.func @transform_1(%arg0: i32) -> (i32, i32) {
    %c0_i32 = arith.constant 0 : i32
    %c0_i32_0 = arith.constant 0 : i32
    %c0_i32_1 = arith.constant 0 : i32
    return %c0_i32, %c0_i32_0 : i32, i32
  }
  func.func @transform_2(%arg0: i32) -> (i32, i32) {
    %c0_i32 = arith.constant 0 : i32
    %c0_i32_0 = arith.constant 0 : i32
    %c0_i32_1 = arith.constant 0 : i32
    return %c0_i32, %c0_i32_0 : i32, i32
  }
  func.func @transform_3(%arg0: i32) -> (i32, i32, i32) {
    %c0_i32 = arith.constant 0 : i32
    %c0_i32_0 = arith.constant 0 : i32
    %c0_i32_1 = arith.constant 0 : i32
    %c0_i32_2 = arith.constant 0 : i32
    return %c0_i32, %c0_i32_0, %c0_i32_1 : i32, i32, i32
  }
  func.func @transform_4(%arg0: i32) -> (i32, i32, i32) {
    %c0_i32 = arith.constant 0 : i32
    %c0_i32_0 = arith.constant 0 : i32
    %c0_i32_1 = arith.constant 0 : i32
    %c0_i32_2 = arith.constant 0 : i32
    return %c0_i32, %c0_i32_0, %c0_i32_1 : i32, i32, i32
  }
  func.func @transform_5(%arg0: i32) -> (i32, i32) {
    %c0_i32 = arith.constant 0 : i32
    %c0_i32_0 = arith.constant 0 : i32
    %c0_i32_1 = arith.constant 0 : i32
    return %c0_i32, %c0_i32_0 : i32, i32
  }
  func.func @transform_6(%arg0: i32) -> (i32, i32, i32) {
    %c0_i32 = arith.constant 0 : i32
    %c0_i32_0 = arith.constant 0 : i32
    %c0_i32_1 = arith.constant 0 : i32
    %c0_i32_2 = arith.constant 0 : i32
    return %c0_i32, %c0_i32_0, %c0_i32_1 : i32, i32, i32
  }
}

</mosaic_0001>

<bundles_post_ra>
// kernel: basic_block_q_forward.1
= control target key start
LH: loop header
LB: loop body
LE: loop exit
PB: predicated region body
PF: predicated region fallthrough
CT: control target
= control target key end

     0   :  { %v1443_v3 = vmov 0   ;;  %s1444_s9 = smov 127   ;;  %s1445_s10 = smov 126   ;;  %vm160_vm0 = vcmask 130048   ;;  %vm61_vm1 = vcmask 1039360   ;;  %vm73_vm2 = vcmask 1031168   ;;  %s2203_s0 = inlined_call_operand.vmem [shape: f32[2,16,362], index: 0, kind: input, shape index: {}]   ;;  %s2204_s1 = inlined_call_operand.vmem [shape: bf16[16,144], index: 1, kind: input, shape index: {}]   ;;  %s2205_s5 = inlined_call_operand.vmem [shape: f32[1,324], index: 5, kind: input, shape index: {}]   ;;  %s2206_s3 = inlined_call_operand.vmem [shape: f32[2,16,1], index: 3, kind: input, shape index: {}]   ;;  %s2207_s2 = inlined_call_operand.vmem [shape: bf16[16,144], index: 2, kind: input, shape index: {}]   ;;  %s2208_s4 = inlined_call_operand.vmem [shape: f32[2,16,1], index: 4, kind: input, shape index: {}]   ;;  %s2209_s6 = inlined_call_operand.vmem [shape: f32[2,16,324], index: 6, kind: output, shape index: {}]  }
   0x1   :  { %v33_v0 = vld [vmem:[%s2203_s0 + $0x8] sm:$0xff]  ;;  %v36_v1 = vld [vmem:[%s2203_s0 + $0x20] sm:$0xff]  ;;  %207 = vmatprep.subr.bf16.mxu1 %v1443_v3  ;;  %1415 = vset.pattern.permute.xlu1 %v1443_v3  ;;  %v35_v5 = vld [vmem:[%s2203_s0 + $0x18] sm:$0xff]  ;;  %s1446_s11 = smov 110   ;;  %s1447_s12 = smov 109   ;;  %vm85_vm3 = vcmask 900096  }
   0x2   :  { %v32_v2 = vld [vmem:[%s2203_s0] sm:$0xff]  ;;  %v50_v4 = vpack.c.bf16 %v36_v1, %v33_v0  ;;  %v34_v6 = vld [vmem:[%s2203_s0 + $0x10] sm:$0xff]  ;;  %v37_v7 = vld [vmem:[%s2203_s0 + $0x28] sm:$0xff]  ;;  %1416 = vset.pattern.permute.xlu0 %v1443_v3  ;;  %s1448_s13 = smov 108   ;;  %s1449_s14 = smov 92   ;;  %vm97_vm4 = vcmask 891904  }
   0x3   :  { %v49_v8 = vpack.c.bf16 %v35_v5, %v32_v2  ;;  %v51_v9 = vpack.c.bf16 %v37_v7, %v34_v6  ;;  %v1531_v10 = vld [vmem:[%s2204_s1 + $0x4] ss:$8 sps:$4 sm:$0xff]   ;;  %s1450_s17 = smov 91   ;;  %s1451_s18 = smov 90   ;;  %v39_v11 = vld [vmem:[%s2203_s0 + $0x38] sm:$0xff]  ;;  %v42_v12 = vld [vmem:[%s2203_s0 + $0x50] sm:$0xff] }
   0x4   :  { %57 = vrot.lane.b32.xlu0 %v50_v4, %s1444_s9  ;;  %164 = vmatprep.subr.bf16.mxu0 %v50_v4  ;;  %v40_v13 = vld [vmem:[%s2203_s0 + $0x40] sm:$0xff]  ;;  %v43_v14 = vld [vmem:[%s2203_s0 + $0x58] sm:$0xff]  ;;  %v1554_v15 = vpack.c.bf16 %v42_v12, %v39_v11  ;;  %v38_v17 = vld [vmem:[%s2203_s0 + $0x30] sm:$0xff]  ;;  %vm109_vm5 = vcmask 883712   ;;  %vm121_vm6 = vcmask 752640   ;;  %vm133_vm7 = vcmask 744448  }
   0x5   :  { %55 = vrot.lane.b32.xlu1 %v49_v8, %s1444_s9  ;;  %208 = vmatpush1.bf16.msra.mxu1 %v51_v9  ;;  %v1557_v16 = vpack.c.bf16 %v43_v14, %v40_v13  ;;  %v41_v18 = vld [vmem:[%s2203_s0 + $0x48] sm:$0xff]  ;;  %vm145_vm8 = vcmask 736256   ;;  %vm449_vm9 = vcmask 556032   ;;  %vm625_vm10 = vcmask 154624  }
   0x6   :  { %165 = vmatpush1.bf16.msra.mxu0 %v49_v8  ;;  %209 = vmatprep.subr.bf16.mxu1 %v1443_v3  ;;  %v1567_v19 = vpack.c.bf16 %v41_v18, %v38_v17  ;;  %v1639_v57 = vld [vmem:[%s2204_s1] ss:$8 sps:$4 sm:$0xff]   ;;  %vm634_vm11 = vcmask 711680   ;;  %vm1823_vm12 = vmneg %vm625_vm10 }
   0x7   :  { %1362 = vmatprep.mubr.msk.bf16.mxu1 %vm160_vm0, %v1531_v10  ;;  %1361 = vmatprep.mubr.msk.bf16.mxu0 %vm160_vm0, %v1531_v10 }
   0x8   :  { %59 = vrot.lane.b32.xlu0 %v51_v9, %s1444_s9 }
   0x9   :  { %69 = vrot.lane.b32.xlu1 %v50_v4, %s1445_s10 }
   0xc   :  { %71 = vrot.lane.b32.xlu0 %v51_v9, %s1445_s10 }
   0xd   :  { %67 = vrot.lane.b32.xlu1 %v49_v8, %s1445_s10 }
  0x10   :  { %81 = vrot.lane.b32.xlu0 %v50_v4, %s1446_s11 }
  0x11   :  { %83 = vrot.lane.b32.xlu1 %v51_v9, %s1446_s11 }
  0x14   :  { %79 = vrot.lane.b32.xlu0 %v49_v8, %s1446_s11 }
  0x15   :  { %93 = vrot.lane.b32.xlu1 %v50_v4, %s1447_s12 }
  0x18   :  { %95 = vrot.lane.b32.xlu0 %v51_v9, %s1447_s12 }
  0x19   :  { %91 = vrot.lane.b32.xlu1 %v49_v8, %s1447_s12 }
  0x1c   :  { %105 = vrot.lane.b32.xlu0 %v50_v4, %s1448_s13 }
  0x1d   :  { %107 = vrot.lane.b32.xlu1 %v51_v9, %s1448_s13 }
  0x20   :  { %103 = vrot.lane.b32.xlu0 %v49_v8, %s1448_s13 }
  0x21   :  { %117 = vrot.lane.b32.xlu1 %v50_v4, %s1449_s14 }
  0x24   :  { %119 = vrot.lane.b32.xlu0 %v51_v9, %s1449_s14 }
  0x25   :  { %115 = vrot.lane.b32.xlu1 %v49_v8, %s1449_s14 }
  0x28   :  { %129 = vrot.lane.b32.xlu0 %v50_v4, %s1450_s17 }
  0x29   :  { %131 = vrot.lane.b32.xlu1 %v51_v9, %s1450_s17 }
  0x2c   :  { %127 = vrot.lane.b32.xlu0 %v49_v8, %s1450_s17 }
  0x2d   :  { %141 = vrot.lane.b32.xlu1 %v50_v4, %s1451_s18 }
  0x30   :  { %143 = vrot.lane.b32.xlu0 %v51_v9, %s1451_s18 }
  0x31   :  { %139 = vrot.lane.b32.xlu1 %v49_v8, %s1451_s18 }
  0x34   :  { %256 = vrot.lane.b32.xlu0 %v1554_v15, %s1444_s9 }
  0x35   :  { %258 = vrot.lane.b32.xlu1 %v1557_v16, %s1444_s9 }
  0x38   :  { %254 = vrot.lane.b32.xlu0 %v1567_v19, %s1444_s9 }
  0x39   :  { %267 = vrot.lane.b32.xlu1 %v1554_v15, %s1445_s10 }
  0x3c   :  { %269 = vrot.lane.b32.xlu0 %v1557_v16, %s1445_s10 }
  0x3d   :  { %265 = vrot.lane.b32.xlu1 %v1567_v19, %s1445_s10 }
  0x40   :  { %278 = vrot.lane.b32.xlu0 %v1554_v15, %s1446_s11 }
  0x41   :  { %280 = vrot.lane.b32.xlu1 %v1557_v16, %s1446_s11 }
  0x44   :  { %276 = vrot.lane.b32.xlu0 %v1567_v19, %s1446_s11 }
  0x45   :  { %289 = vrot.lane.b32.xlu1 %v1554_v15, %s1447_s12 }
  0x48   :  { %291 = vrot.lane.b32.xlu0 %v1557_v16, %s1447_s12 }
  0x49   :  { %287 = vrot.lane.b32.xlu1 %v1567_v19, %s1447_s12 }
  0x4c   :  { %300 = vrot.lane.b32.xlu0 %v1554_v15, %s1448_s13 }
  0x4d   :  { %302 = vrot.lane.b32.xlu1 %v1557_v16, %s1448_s13 }
  0x50   :  { %298 = vrot.lane.b32.xlu0 %v1567_v19, %s1448_s13 }
  0x51   :  { %311 = vrot.lane.b32.xlu1 %v1554_v15, %s1449_s14 }
  0x54   :  { %313 = vrot.lane.b32.xlu0 %v1557_v16, %s1449_s14 }
  0x55   :  { %309 = vrot.lane.b32.xlu1 %v1567_v19, %s1449_s14 }
  0x58   :  { %322 = vrot.lane.b32.xlu0 %v1554_v15, %s1450_s17 }
  0x59   :  { %324 = vrot.lane.b32.xlu1 %v1557_v16, %s1450_s17 }
  0x5c   :  { %320 = vrot.lane.b32.xlu0 %v1567_v19, %s1450_s17 }
  0x5d   :  { %333 = vrot.lane.b32.xlu1 %v1554_v15, %s1451_s18 }
  0x60   :  { %335 = vrot.lane.b32.xlu0 %v1557_v16, %s1451_s18 }
  0x61   :  { %331 = vrot.lane.b32.xlu1 %v1567_v19, %s1451_s18 }
  0x76   :  { %v58_v20 = vpop.permute.xlu0 %57 }
  0x77   :  { %v56_v21 = vpop.permute.xlu1 %55 }
  0x78   :  { %v62_v25 = vsel %vm61_vm1, %v56_v21, %v58_v20 }
  0x7a   :  { %v60_v22 = vpop.permute.xlu0 %59 }
  0x7b   :  { %v70_v23 = vpop.permute.xlu1 %69  ;;  %210 = vmatpush1.bf16.msra.mxu1 %v60_v22  ;;  %v63_v24 = vsel %vm61_vm1, %v58_v20, %v60_v22 }
  0x7c   :  { %166 = vmatprep.subr.bf16.mxu0 %v63_v24  ;;  %211 = vmatprep.subr.bf16.mxu1 %v1443_v3 }
  0x7d   :  { %167 = vmatpush1.bf16.msra.mxu0 %v62_v25 }
  0x7e   :  { %v72_v26 = vpop.permute.xlu0 %71 }
  0x7f   :  { %v68_v27 = vpop.permute.xlu1 %67  ;;  %212 = vmatpush1.bf16.msra.mxu1 %v72_v26  ;;  %v75_v28 = vsel %vm73_vm2, %v70_v23, %v72_v26 }
  0x80   :  { %168 = vmatprep.subr.bf16.mxu0 %v75_v28  ;;  %v74_v29 = vsel %vm73_vm2, %v68_v27, %v70_v23  ;;  %213 = vmatprep.subr.bf16.mxu1 %v1443_v3 }
  0x81   :  { %169 = vmatpush1.bf16.msra.mxu0 %v74_v29 }
  0x82   :  { %v82_v30 = vpop.permute.xlu0 %81 }
  0x83   :  { %v84_v31 = vpop.permute.xlu1 %83 }
  0x84   :  { %v87_v32 = vsel %vm85_vm3, %v82_v30, %v84_v31  ;;  %214 = vmatpush1.bf16.msra.mxu1 %v84_v31 }
  0x85   :  { %170 = vmatprep.subr.bf16.mxu0 %v87_v32  ;;  %215 = vmatprep.subr.bf16.mxu1 %v1443_v3 }
  0x86   :  { %v80_v33 = vpop.permute.xlu0 %79 }
  0x87   :  { %v94_v34 = vpop.permute.xlu1 %93  ;;  %v86_v35 = vsel %vm85_vm3, %v80_v33, %v82_v30 }
  0x88   :  { %171 = vmatpush1.bf16.msra.mxu0 %v86_v35 }
  0x8a   :  { %v96_v36 = vpop.permute.xlu0 %95 }
  0x8b   :  { %v92_v37 = vpop.permute.xlu1 %91  ;;  %216 = vmatpush1.bf16.msra.mxu1 %v96_v36  ;;  %v99_v38 = vsel %vm97_vm4, %v94_v34, %v96_v36 }
  0x8c   :  { %172 = vmatprep.subr.bf16.mxu0 %v99_v38  ;;  %v98_v39 = vsel %vm97_vm4, %v92_v37, %v94_v34  ;;  %217 = vmatprep.subr.bf16.mxu1 %v1443_v3  ;;  %v427_v38 = vlaneseq }
  0x8d   :  { %173 = vmatpush1.bf16.msra.mxu0 %v98_v39 }
  0x8e   :  { %v106_v40 = vpop.permute.xlu0 %105  ;;  %v428_v39 = vshrl.u32 %v427_v38, 7 }
  0x8f   :  { %v108_v41 = vpop.permute.xlu1 %107 }
  0x90   :  { %v111_v42 = vsel %vm109_vm5, %v106_v40, %v108_v41  ;;  %218 = vmatpush1.bf16.msra.mxu1 %v108_v41  ;;  %v48_v41 = vld [vmem:[%s2205_s5] sm:$0x7] }
  0x91   :  { %174 = vmatprep.subr.bf16.mxu0 %v111_v42  ;;  %219 = vmatprep.subr.bf16.mxu1 %v1443_v3  ;;  %v429_v42 = vsub.s32 0, %v428_v39 }
  0x92   :  { %v104_v43 = vpop.permute.xlu0 %103 }
  0x93   :  { %v118_v44 = vpop.permute.xlu1 %117  ;;  %v110_v45 = vsel %vm109_vm5, %v104_v43, %v106_v40  ;;  %v437_v40 = vsub.s32 2, %v428_v39  ;;  %v433_v43 = vsub.s32 1, %v428_v39 }
  0x94   :  { %175 = vmatpush1.bf16.msra.mxu0 %v110_v45  ;;  %v1685_v45 = vrot.slane %v48_v41, %v429_v42 }
  0x96   :  { %v120_v46 = vpop.permute.xlu0 %119 }
  0x97   :  { %v116_v47 = vpop.permute.xlu1 %115  ;;  %220 = vmatpush1.bf16.msra.mxu1 %v120_v46  ;;  %v123_v48 = vsel %vm121_vm6, %v118_v44, %v120_v46  ;;  %v1687_v46 = vrot.slane %v48_v41, %v433_v43 }
  0x98   :  { %176 = vmatprep.subr.bf16.mxu0 %v123_v48  ;;  %v122_v49 = vsel %vm121_vm6, %v116_v47, %v118_v44  ;;  %221 = vmatprep.subr.bf16.mxu1 %v1443_v3  ;;  %v1683_v44 = vrot.slane %v48_v41, %v437_v40 }
  0x99   :  { %177 = vmatpush1.bf16.msra.mxu0 %v122_v49 }
  0x9a   :  { %v130_v50 = vpop.permute.xlu0 %129 }
  0x9b   :  { %v132_v51 = vpop.permute.xlu1 %131 }
  0x9c   :  { %v135_v52 = vsel %vm133_vm7, %v130_v50, %v132_v51  ;;  %222 = vmatpush1.bf16.msra.mxu1 %v132_v51 }
  0x9d   :  { %178 = vmatprep.subr.bf16.mxu0 %v135_v52  ;;  %223 = vmatprep.subr.bf16.mxu1 %v1443_v3 }
  0x9e   :  { %v128_v53 = vpop.permute.xlu0 %127 }
  0x9f   :  { %v142_v54 = vpop.permute.xlu1 %141  ;;  %v134_v55 = vsel %vm133_vm7, %v128_v53, %v130_v50 }
  0xa0   :  { %179 = vmatpush1.bf16.msra.mxu0 %v134_v55 }
  0xa2   :  { %v144_v56 = vpop.permute.xlu0 %143 }
  0xa3   :  { %v140_v58 = vpop.permute.xlu1 %139  ;;  %224 = vmatpush1.bf16.msra.mxu1 %v144_v56  ;;  %v147_v59 = vsel %vm145_vm8, %v142_v54, %v144_v56 }
  0xa4   :  { %180 = vmatprep.subr.bf16.mxu0 %v147_v59  ;;  %v146_v60 = vsel %vm145_vm8, %v140_v58, %v142_v54  ;;  %385 = vmatprep.subr.bf16.mxu1 %v1443_v3 }
  0xa5   :  { %181 = vmatpush1.bf16.msra.mxu0 %v146_v60 }
  0xa6   :  { %v257_v61 = vpop.permute.xlu0 %256  ;;  %240 = vmatmul.mubr.bf16.vlgmr.msra.gmra.mrb[0].mxu1 %v1639_v57  ;;  %342 = vmatprep.subr.bf16.mxu0 %v1554_v15 }
  0xa7   :  { %v259_v62 = vpop.permute.xlu1 %258  ;;  %386 = vmatpush1.bf16.msra.mxu1 %v1557_v16  ;;  %1364 = vmatprep.mubr.msk.bf16.mxu1 %vm160_vm0, %v1531_v10 }
  0xa8   :  { %197 = vmatmul.mubr.bf16.vlgmr.msra.gmra.mrb[0].mxu0 %v1639_v57  ;;  %387 = vmatprep.subr.bf16.mxu1 %v1443_v3  ;;  %v261_v63 = vsel %vm61_vm1, %v257_v61, %v259_v62 }
  0xa9   :  { %343 = vmatpush1.bf16.msra.mxu0 %v1567_v19  ;;  %1363 = vmatprep.mubr.msk.bf16.mxu0 %vm160_vm0, %v1531_v10 }
  0xaa   :  { %v255_v0 = vpop.permute.xlu0 %254  ;;  %344 = vmatprep.subr.bf16.mxu0 %v261_v63 }
  0xab   :  { %v260_v1 = vsel %vm61_vm1, %v255_v0, %v257_v61  ;;  %v268_v2 = vpop.permute.xlu1 %267  ;;  %388 = vmatpush1.bf16.msra.mxu1 %v259_v62 }
  0xac   :  { %389 = vmatprep.subr.bf16.mxu1 %v1443_v3 }
  0xad   :  { %345 = vmatpush1.bf16.msra.mxu0 %v260_v1 }
  0xae   :  { %v270_v4 = vpop.permute.xlu0 %269 }
  0xaf   :  { %v266_v5 = vpop.permute.xlu1 %265  ;;  %390 = vmatpush1.bf16.msra.mxu1 %v270_v4  ;;  %v272_v6 = vsel %vm73_vm2, %v268_v2, %v270_v4 }
  0xb0   :  { %v271_v7 = vsel %vm73_vm2, %v266_v5, %v268_v2  ;;  %346 = vmatprep.subr.bf16.mxu0 %v272_v6  ;;  %391 = vmatprep.subr.bf16.mxu1 %v1443_v3 }
  0xb1   :  { %347 = vmatpush1.bf16.msra.mxu0 %v271_v7 }
  0xb2   :  { %v279_v8 = vpop.permute.xlu0 %278 }
  0xb3   :  { %v281_v9 = vpop.permute.xlu1 %280 }
  0xb4   :  { %v283_v10 = vsel %vm85_vm3, %v279_v8, %v281_v9  ;;  %392 = vmatpush1.bf16.msra.mxu1 %v281_v9 }
  0xb5   :  { %348 = vmatprep.subr.bf16.mxu0 %v283_v10  ;;  %393 = vmatprep.subr.bf16.mxu1 %v1443_v3 }
  0xb6   :  { %v277_v11 = vpop.permute.xlu0 %276 }
  0xb7   :  { %v282_v12 = vsel %vm85_vm3, %v277_v11, %v279_v8  ;;  %v290_v13 = vpop.permute.xlu1 %289 }
  0xb8   :  { %349 = vmatpush1.bf16.msra.mxu0 %v282_v12 }
  0xba   :  { %v292_v14 = vpop.permute.xlu0 %291 }
  0xbb   :  { %v288_v15 = vpop.permute.xlu1 %287  ;;  %394 = vmatpush1.bf16.msra.mxu1 %v292_v14  ;;  %v294_v16 = vsel %vm97_vm4, %v290_v13, %v292_v14 }
  0xbc   :  { %v293_v17 = vsel %vm97_vm4, %v288_v15, %v290_v13  ;;  %350 = vmatprep.subr.bf16.mxu0 %v294_v16  ;;  %395 = vmatprep.subr.bf16.mxu1 %v1443_v3 }
  0xbd   :  { %351 = vmatpush1.bf16.msra.mxu0 %v293_v17 }
  0xbe   :  { %v301_v18 = vpop.permute.xlu0 %300 }
  0xbf   :  { %v303_v19 = vpop.permute.xlu1 %302 }
  0xc0   :  { %v305_v20 = vsel %vm109_vm5, %v301_v18, %v303_v19  ;;  %396 = vmatpush1.bf16.msra.mxu1 %v303_v19 }
  0xc1   :  { %352 = vmatprep.subr.bf16.mxu0 %v305_v20  ;;  %397 = vmatprep.subr.bf16.mxu1 %v1443_v3 }
  0xc2   :  { %v299_v21 = vpop.permute.xlu0 %298 }
  0xc3   :  { %v304_v22 = vsel %vm109_vm5, %v299_v21, %v301_v18  ;;  %v312_v23 = vpop.permute.xlu1 %311 }
  0xc4   :  { %353 = vmatpush1.bf16.msra.mxu0 %v304_v22 }
  0xc6   :  { %v314_v24 = vpop.permute.xlu0 %313 }
  0xc7   :  { %v310_v25 = vpop.permute.xlu1 %309  ;;  %398 = vmatpush1.bf16.msra.mxu1 %v314_v24  ;;  %v316_v26 = vsel %vm121_vm6, %v312_v23, %v314_v24 }
  0xc8   :  { %v315_v27 = vsel %vm121_vm6, %v310_v25, %v312_v23  ;;  %354 = vmatprep.subr.bf16.mxu0 %v316_v26  ;;  %399 = vmatprep.subr.bf16.mxu1 %v1443_v3 }
  0xc9   :  { %355 = vmatpush1.bf16.msra.mxu0 %v315_v27 }
  0xca   :  { %v323_v28 = vpop.permute.xlu0 %322 }
  0xcb   :  { %v325_v29 = vpop.permute.xlu1 %324 }
  0xcc   :  { %v327_v30 = vsel %vm133_vm7, %v323_v28, %v325_v29  ;;  %400 = vmatpush1.bf16.msra.mxu1 %v325_v29 }
  0xcd   :  { %356 = vmatprep.subr.bf16.mxu0 %v327_v30  ;;  %401 = vmatprep.subr.bf16.mxu1 %v1443_v3 }
  0xce   :  { %v321_v31 = vpop.permute.xlu0 %320 }
  0xcf   :  { %v326_v32 = vsel %vm133_vm7, %v321_v31, %v323_v28  ;;  %v334_v33 = vpop.permute.xlu1 %333 }
  0xd0   :  { %357 = vmatpush1.bf16.msra.mxu0 %v326_v32 }
  0xd2   :  { %v336_v34 = vpop.permute.xlu0 %335 }
  0xd3   :  { %v332_v35 = vpop.permute.xlu1 %331  ;;  %402 = vmatpush1.bf16.msra.mxu1 %v336_v34  ;;  %v338_v36 = vsel %vm145_vm8, %v334_v33, %v336_v34 }
  0xd4   :  { %v337_v37 = vsel %vm145_vm8, %v332_v35, %v334_v33  ;;  %358 = vmatprep.subr.bf16.mxu0 %v338_v36  ;;  %852 = vmatprep.subr.bf16.mxu1 %v1443_v3 }
  0xd5   :  { %359 = vmatpush1.bf16.msra.mxu0 %v337_v37 }
  0xd6   :  { %418 = vmatmul.mubr.bf16.vlgmr.msra.gmra.mrb[4].mxu1 %v1639_v57 }
  0xd8   :  { %375 = vmatmul.mubr.bf16.vlgmr.msra.gmra.mrb[4].mxu0 %v1639_v57 }
 0x179   :  { %v1689_v47 = vpop.f32.mrb[0].mxu1 }
 0x17a   :  { %v444_v48 = vmul.f32 %v1683_v44, %v1689_v47  ;;  %v481_v49 = vmul.f32 %v1689_v47, %v1689_v47  ;;  %v243_v50 = vpop.f32.mrb[1].mxu1 }
 0x17b   :  { %v1695_v51 = vpop.f32.mrb[0].mxu0  ;;  %v1697_v52 = vpop.f32.mrb[2].mxu1 }
 0x17c   :  { %v442_v53 = vmul.f32 %v1685_v45, %v1695_v51  ;;  %v479_v54 = vmul.f32 %v1695_v51, %v1695_v51  ;;  %v1703_v55 = vpop.f32.mrb[1].mxu0  ;;  %v447_v56 = vmul.f32 %v1683_v44, %v1697_v52  ;;  %v484_v57 = vmul.f32 %v1697_v52, %v1697_v52  ;;  %v246_v58 = vpop.f32.mrb[3].mxu1 }
 0x17d   :  { %v443_v59 = vmul.f32 %v1687_v46, %v1703_v55  ;;  %v480_v60 = vmul.f32 %v1703_v55, %v1703_v55  ;;  %v1713_v61 = vpop.f32.mrb[2].mxu0  ;;  %v487_v62 = vmul.f32 %v481_v49, %v1683_v44  ;;  %v450_v2 = vsel %vm449_vm9, %v444_v48, 0.0 }
 0x17e   :  { %v445_v63 = vmul.f32 %v1685_v45, %v1713_v61  ;;  %v482_v0 = vmul.f32 %v1713_v61, %v1713_v61  ;;  %v1720_v1 = vpop.f32.mrb[3].mxu0  ;;  %v490_v4 = vmul.f32 %v484_v57, %v1683_v44  ;;  %v485_v8 = vmul.f32 %v479_v54, %v1685_v45 }
 0x17f   :  { %v446_v5 = vmul.f32 %v1687_v46, %v1720_v1  ;;  %v483_v6 = vmul.f32 %v1720_v1, %v1720_v1  ;;  %v448_v7 = vadd.f32 %v443_v59, %v442_v53  ;;  %v455_v9 = vsel %vm449_vm9, %v447_v56, 0.0 }
 0x180   :  { %v488_v10 = vmul.f32 %v482_v0, %v1685_v45  ;;  %v486_v11 = vmul.f32 %v480_v60, %v1687_v46  ;;  %v492_v15 = vsel %vm449_vm9, %v487_v62, 0.0  ;;  %v497_v16 = vsel %vm449_vm9, %v490_v4, 0.0 }
 0x181   :  { %v451_v12 = vadd.f32 %v450_v2, %v448_v7  ;;  %v454_v13 = vadd.f32 %v446_v5, %v445_v63  ;;  %v489_v14 = vmul.f32 %v483_v6, %v1687_v46 }
 0x182   :  { %v491_v17 = vadd.f32 %v486_v11, %v485_v8 }
 0x183   :  { %452 = vadd.xlane.f32.xlu0 %v451_v12  ;;  %v456_v18 = vadd.f32 %v455_v9, %v454_v13  ;;  %v496_v19 = vadd.f32 %v489_v14, %v488_v10 }
 0x184   :  { %v493_v20 = vadd.f32 %v492_v15, %v491_v17 }
 0x185   :  { %457 = vadd.xlane.f32.xlu1 %v456_v18  ;;  %v498_v21 = vadd.f32 %v497_v16, %v496_v19 }
 0x187   :  { %499 = vadd.xlane.f32.xlu0 %v498_v21 }
 0x189   :  { %494 = vadd.xlane.f32.xlu1 %v493_v20 }
 0x1a9   :  { %v1735_v22 = vpop.f32.mrb[4].mxu1 }
 0x1aa   :  { %v463_v23 = vmul.f32 %v1683_v44, %v1735_v22  ;;  %v505_v24 = vmul.f32 %v1735_v22, %v1735_v22  ;;  %v421_v25 = vpop.f32.mrb[5].mxu1 }
 0x1ab   :  { %v1741_v26 = vpop.f32.mrb[4].mxu0  ;;  %v1743_v27 = vpop.f32.mrb[6].mxu1 }
 0x1ac   :  { %v461_v28 = vmul.f32 %v1685_v45, %v1741_v26  ;;  %v503_v29 = vmul.f32 %v1741_v26, %v1741_v26  ;;  %v1749_v30 = vpop.f32.mrb[5].mxu0  ;;  %v508_v31 = vmul.f32 %v1743_v27, %v1743_v27  ;;  %v424_v32 = vpop.f32.mrb[7].mxu1  ;;  %v466_v35 = vmul.f32 %v1683_v44, %v1743_v27 }
 0x1ad   :  { %v462_v33 = vmul.f32 %v1687_v46, %v1749_v30  ;;  %v504_v34 = vmul.f32 %v1749_v30, %v1749_v30  ;;  %v1759_v36 = vpop.f32.mrb[6].mxu0  ;;  %v511_v37 = vmul.f32 %v505_v24, %v1683_v44  ;;  %v468_v41 = vsel %vm449_vm9, %v463_v23, 0.0  ;;  %v24_v32 = vld [vmem:[%s2206_s3] sm:$0xff] }
 0x1ae   :  { %v464_v38 = vmul.f32 %v1685_v45, %v1759_v36  ;;  %v506_v39 = vmul.f32 %v1759_v36, %v1759_v36  ;;  %v1766_v40 = vpop.f32.mrb[7].mxu0  ;;  %v509_v42 = vmul.f32 %v503_v29, %v1685_v45  ;;  %v514_v56 = vmul.f32 %v508_v31, %v1683_v44 }
 0x1af   :  { %v465_v43 = vmul.f32 %v1687_v46, %v1766_v40  ;;  %v507_v48 = vmul.f32 %v1766_v40, %v1766_v40  ;;  %v467_v49 = vadd.f32 %v462_v33, %v461_v28  ;;  %v510_v50 = vmul.f32 %v504_v34, %v1687_v46 }
 0x1b0   :  { %v516_v53 = vsel %vm449_vm9, %v511_v37, 0.0  ;;  %v512_v54 = vmul.f32 %v506_v39, %v1685_v45  ;;  %v473_v62 = vsel %vm449_vm9, %v466_v35, 0.0  ;;  %v521_v4 = vsel %vm449_vm9, %v514_v56, 0.0  ;;  %v26_v35 = vld [vmem:[%s2206_s3 + $0x10] sm:$0xff] }
 0x1b1   :  { %v469_v57 = vadd.f32 %v468_v41, %v467_v49  ;;  %v515_v58 = vadd.f32 %v510_v50, %v509_v42  ;;  %v472_v59 = vadd.f32 %v465_v43, %v464_v38  ;;  %v513_v60 = vmul.f32 %v507_v48, %v1687_v46  ;;  %v25_v38 = vld [vmem:[%s2206_s3 + $0x8] sm:$0xff]  ;;  %v27_v43 = vld [vmem:[%s2206_s3 + $0x18] sm:$0xff]  ;;  %s1452_s3 = smov 19  }
 0x1b3   :  { %470 = vadd.xlane.f32.xlu0 %v469_v57  ;;  %v517_v63 = vadd.f32 %v516_v53, %v515_v58  ;;  %v474_v0 = vadd.f32 %v473_v62, %v472_v59  ;;  %v520_v2 = vadd.f32 %v513_v60, %v512_v54 }
 0x1b5   :  { %518 = vadd.xlane.f32.xlu1 %v517_v63  ;;  %v522_v5 = vadd.f32 %v521_v4, %v520_v2 }
 0x1b7   :  { %475 = vadd.xlane.f32.xlu0 %v474_v0 }
 0x1bb   :  { %523 = vadd.xlane.f32.xlu0 %v522_v5 }
 0x210   :  { %v453_v6 = vpop.xlane.xlu0 %452 }
 0x212   :  { %v458_v7 = vpop.xlane.xlu1 %457 }
 0x214   :  { %v500_v8 = vpop.xlane.xlu0 %499 }
 0x216   :  { %v495_v9 = vpop.xlane.xlu1 %494 }
 0x240   :  { %v471_v10 = vpop.xlane.xlu0 %470 }
 0x241   :  { %v477_v11 = vadd.f32 %v471_v10, %v453_v6 }
 0x242   :  { %v519_v12 = vpop.xlane.xlu1 %518 }
 0x243   :  { %v527_v13 = vmul.f32 0.001953125, %v477_v11  ;;  %v525_v14 = vadd.f32 %v519_v12, %v495_v9 }
 0x244   :  { %v476_v15 = vpop.xlane.xlu0 %475 }
 0x245   :  { %v531_v16 = vmul.f32 %v527_v13, %v527_v13  ;;  %v529_v17 = vmul.f32 0.001953125, %v525_v14  ;;  %v478_v18 = vadd.f32 %v476_v15, %v458_v7 }
 0x247   :  { %v533_v19 = vsub.f32 %v529_v17, %v531_v16  ;;  %v528_v20 = vmul.f32 0.001953125, %v478_v18 }
 0x248   :  { %v524_v21 = vpop.xlane.xlu0 %523 }
 0x249   :  { %v535_v23 = vadd.f32 1e-05, %v533_v19  ;;  %v526_v24 = vadd.f32 %v524_v21, %v500_v8  ;;  %v532_v25 = vmul.f32 %v528_v20, %v528_v20 }
 0x24b   :  { %1423 = vrsqrt.f32 %v535_v23  ;;  %v530_v28 = vmul.f32 0.001953125, %v526_v24 }
 0x24d   :  { %v534_v29 = vsub.f32 %v530_v28, %v532_v25 }
 0x24f   :  { %v536_v31 = vadd.f32 1e-05, %v534_v29 }
 0x251   :  { %1425 = vrsqrt.f32 %v536_v31 }
 0x255   :  { %v1424_v33 = vpop.eup %1423 }
 0x256   :  { %v539_v34 = vmul.f32 %v1424_v33, %v24_v32 }
 0x258   :  { %547 = vperm.xlu1 %1415, %v539_v34   ;;  %v541_v37 = vmul.f32 %v539_v34, %v527_v13 }
 0x25a   :  { %v543_v39 = vsub.f32 %v26_v35, %v541_v37 }
 0x25b   :  { %v1426_v41 = vpop.eup %1425 }
 0x25c   :  { %563 = vperm.xlu1 %1415, %v543_v39   ;;  %v540_v42 = vmul.f32 %v1426_v41, %v25_v38 }
 0x25e   :  { %552 = vperm.xlu0 %1416, %v540_v42   ;;  %v542_v48 = vmul.f32 %v540_v42, %v528_v20 }
 0x260   :  { %v544_v49 = vsub.f32 %v27_v43, %v542_v48 }
 0x262   :  { %568 = vperm.xlu1 %1415, %v544_v49  }
 0x2d7   :  { %v548_v50 = vpop.permute.xlu1 %547 }
 0x2d8   :  { %v555_v53 = vmul.f32 %v548_v50, %v1695_v51  ;;  %v556_v54 = vmul.f32 %v548_v50, %v1703_v55  ;;  %v557_v56 = vmul.f32 %v548_v50, %v1689_v47  ;;  %v639_v57 = vmul.f32 %v548_v50, %v1749_v30 }
 0x2d9   :  { %v638_v58 = vmul.f32 %v548_v50, %v1741_v26  ;;  %v640_v59 = vmul.f32 %v548_v50, %v1735_v22 }
 0x2db   :  { %v564_v60 = vpop.permute.xlu1 %563 }
 0x2dc   :  { %v572_v62 = vadd.f32 %v564_v60, %v556_v54  ;;  %v573_v63 = vadd.f32 %v564_v60, %v557_v56  ;;  %v571_v0 = vadd.f32 %v564_v60, %v555_v53  ;;  %v645_v2 = vadd.f32 %v639_v57, %v564_v60 }
 0x2dd   :  { %v553_v4 = vpop.permute.xlu0 %552  ;;  %v646_v5 = vadd.f32 %v640_v59, %v564_v60  ;;  %v1799_v6 = vadd.f32 %v638_v58, %v564_v60 }
 0x2de   :  { %v558_v51 = vmul.f32 %v553_v4, %v1713_v61  ;;  %v559_v55 = vmul.f32 %v553_v4, %v1720_v1  ;;  %v560_v47 = vmul.f32 %v553_v4, %v1697_v52  ;;  %v641_v30 = vmul.f32 %v553_v4, %v1759_v36 }
 0x2df   :  { %v578_v26 = vmax.f32 %v572_v62, 0.0  ;;  %v579_v7 = vmax.f32 %v573_v63, 0.0  ;;  %v642_v22 = vmul.f32 %v553_v4, %v1766_v40  ;;  %v643_v8 = vmul.f32 %v553_v4, %v1743_v27 }
 0x2e0   :  { %v577_v9 = vmax.f32 %v571_v0, 0.0  ;;  %v651_v10 = vmax.f32 %v645_v2, 0.0  ;;  %v652_v14 = vmax.f32 %v646_v5, 0.0  ;;  %v650_v61 = vmax.f32 %v1799_v6, 0.0 }
 0x2e1   :  { %v569_v11 = vpop.permute.xlu1 %568  ;;  %v584_v12 = vmin.f32 %v578_v26, 1.0  ;;  %v585_v13 = vmin.f32 %v579_v7, 1.0 }
 0x2e2   :  { %v575_v15 = vadd.f32 %v569_v11, %v559_v55  ;;  %v576_v1 = vadd.f32 %v569_v11, %v560_v47  ;;  %v574_v16 = vadd.f32 %v569_v11, %v558_v51  ;;  %v583_v52 = vmin.f32 %v577_v9, 1.0 }
 0x2e3   :  { %v590_v17 = vmul.f32 15.0, %v584_v12  ;;  %v591_v36 = vmul.f32 15.0, %v585_v13  ;;  %v648_v18 = vadd.f32 %v642_v22, %v569_v11  ;;  %v657_v19 = vmin.f32 %v651_v10, 1.0 }
 0x2e4   :  { %v581_v20 = vmax.f32 %v575_v15, 0.0  ;;  %v582_v40 = vmax.f32 %v576_v1, 0.0  ;;  %v580_v21 = vmax.f32 %v574_v16, 0.0  ;;  %v589_v27 = vmul.f32 15.0, %v583_v52 }
 0x2e5   :  { %v1382_v23 = vround.rtne.f32 %v590_v17  ;;  %v1383_v24 = vround.rtne.f32 %v591_v36  ;;  %v654_v25 = vmax.f32 %v648_v18, 0.0  ;;  %v663_v28 = vmul.f32 15.0, %v657_v19 }
 0x2e6   :  { %v587_v29 = vmin.f32 %v581_v20, 1.0  ;;  %v588_v31 = vmin.f32 %v582_v40, 1.0  ;;  %v586_v32 = vmin.f32 %v580_v21, 1.0  ;;  %v1381_v33 = vround.rtne.f32 %v589_v27 }
 0x2e7   :  { %v602_v34 = vmul.f32 0.06666667, %v1382_v23  ;;  %v603_v35 = vmul.f32 0.06666667, %v1383_v24  ;;  %v660_v37 = vmin.f32 %v654_v25, 1.0  ;;  %v1388_v38 = vround.rtne.f32 %v663_v28 }
 0x2e8   :  { %v593_v39 = vmul.f32 15.0, %v587_v29  ;;  %v594_v41 = vmul.f32 15.0, %v588_v31  ;;  %v592_v42 = vmul.f32 15.0, %v586_v32  ;;  %v601_v43 = vmul.f32 0.06666667, %v1381_v33 }
 0x2e9   :  { %v608_v48 = vmul.f32 %v602_v34, %v1687_v46  ;;  %v609_v49 = vmul.f32 %v603_v35, %v1683_v44  ;;  %v666_v50 = vmul.f32 15.0, %v660_v37  ;;  %v675_v53 = vmul.f32 0.06666667, %v1388_v38 }
 0x2ea   :  { %v1385_v54 = vround.rtne.f32 %v593_v39  ;;  %v1386_v56 = vround.rtne.f32 %v594_v41  ;;  %v1384_v57 = vround.rtne.f32 %v592_v42  ;;  %v607_v58 = vmul.f32 %v601_v43, %v1685_v45 }
 0x2eb   :  { %v1391_v59 = vround.rtne.f32 %v666_v50  ;;  %v681_v60 = vmul.f32 %v675_v53, %v1687_v46  ;;  %v649_v62 = vadd.f32 %v643_v8, %v569_v11  ;;  %v658_v63 = vmin.f32 %v652_v14, 1.0  ;;  %v1873_v53 = vld [vmem:[%s2207_s2 + $0x4] ss:$8 sps:$4 sm:$0xff]  }
 0x2ec   :  { %v605_v0 = vmul.f32 0.06666667, %v1385_v54  ;;  %v606_v2 = vmul.f32 0.06666667, %v1386_v56  ;;  %v604_v4 = vmul.f32 0.06666667, %v1384_v57  ;;  %v647_v5 = vadd.f32 %v641_v30, %v569_v11  ;;  %1370 = vmatprep.mubr.msk.bf16.mxu1 %vm160_vm0, %v1873_v53  ;;  %1369 = vmatprep.mubr.msk.bf16.mxu0 %vm160_vm0, %v1873_v53 }
 0x2ed   :  { %v678_v6 = vmul.f32 0.06666667, %v1391_v59  ;;  %v655_v51 = vmax.f32 %v649_v62, 0.0  ;;  %v664_v55 = vmul.f32 15.0, %v658_v63  ;;  %v656_v47 = vmin.f32 %v650_v61, 1.0 }
 0x2ee   :  { %v611_v26 = vmul.f32 %v605_v0, %v1687_v46  ;;  %v612_v7 = vmul.f32 %v606_v2, %v1683_v44  ;;  %v610_v22 = vmul.f32 %v604_v4, %v1685_v45  ;;  %v653_v9 = vmax.f32 %v647_v5, 0.0 }
 0x2ef   :  { %v684_v10 = vmul.f32 %v678_v6, %v1687_v46  ;;  %v661_v12 = vmin.f32 %v655_v51, 1.0  ;;  %v1389_v8 = vround.rtne.f32 %v664_v55  ;;  %v662_v13 = vmul.f32 15.0, %v656_v47 }
 0x2f0   :  { %v614_v14 = vpack.c.bf16 %v611_v26, %v608_v48  ;;  %v615_v15 = vpack.c.bf16 %v612_v7, %v609_v49  ;;  %v613_v1 = vpack.c.bf16 %v610_v22, %v607_v58  ;;  %v659_v30 = vmin.f32 %v653_v9, 1.0 }
 0x2f1   :  { %v687_v11 = vpack.c.bf16 %v684_v10, %v681_v60  ;;  %v667_v16 = vmul.f32 15.0, %v661_v12  ;;  %v1387_v52 = vround.rtne.f32 %v662_v13  ;;  %v676_v36 = vmul.f32 0.06666667, %v1389_v8 }
 0x2f2   :  { %621 = vrot.lane.b32.xlu1 %v614_v14, %s1452_s3  ;;  %v665_v61 = vmul.f32 15.0, %v659_v30 }
 0x2f3   :  { %v1392_v17 = vround.rtne.f32 %v667_v16  ;;  %v674_v19 = vmul.f32 0.06666667, %v1387_v52  ;;  %v682_v21 = vmul.f32 %v676_v36, %v1683_v44 }
 0x2f4   :  { %v1390_v18 = vround.rtne.f32 %v665_v61 }
 0x2f5   :  { %v679_v20 = vmul.f32 0.06666667, %v1392_v17  ;;  %v680_v23 = vmul.f32 %v674_v19, %v1685_v45 }
 0x2f6   :  { %623 = vrot.lane.b32.xlu1 %v615_v15, %s1452_s3  ;;  %v677_v40 = vmul.f32 0.06666667, %v1390_v18 }
 0x2f7   :  { %v685_v27 = vmul.f32 %v679_v20, %v1683_v44 }
 0x2f8   :  { %v683_v24 = vmul.f32 %v677_v40, %v1685_v45 }
 0x2f9   :  { %v688_v25 = vpack.c.bf16 %v685_v27, %v682_v21 }
 0x2fa   :  { %619 = vrot.lane.b32.xlu1 %v613_v1, %s1452_s3  ;;  %v686_v28 = vpack.c.bf16 %v683_v24, %v680_v23 }
 0x2fe   :  { %694 = vrot.lane.b32.xlu1 %v687_v11, %s1452_s3 }
 0x302   :  { %696 = vrot.lane.b32.xlu1 %v688_v25, %s1452_s3 }
 0x306   :  { %692 = vrot.lane.b32.xlu1 %v686_v28, %s1452_s3  ;;  %v1943_v28 = vld [vmem:[%s2207_s2] ss:$8 sps:$4 sm:$0xff]  }
 0x364   :  { %v622_v29 = vpop.permute.xlu1 %621 }
 0x368   :  { %v624_v31 = vpop.permute.xlu1 %623 }
 0x369   :  { %v627_v32 = vsel %vm625_vm10, %v622_v29, %v624_v31 }
 0x36a   :  { %v636_v33 = vsel %vm634_vm11, %v627_v32, 0 }
 0x36b   :  { %853 = vmatpush1.bf16.msra.mxu1 %v636_v33 }
 0x36c   :  { %v620_v34 = vpop.permute.xlu1 %619  ;;  %854 = vmatprep.subr.bf16.mxu1 %v1443_v3 }
 0x36d   :  { %v626_v37 = vsel %vm625_vm10, %v620_v34, %v622_v29  ;;  %v632_v39 = vsel %vm625_vm10, 0, %v620_v34 }
 0x36e   :  { %711 = vrot.lane.b32.xlu0 %v626_v37, %s1444_s9  ;;  %809 = vmatprep.subr.bf16.mxu0 %v626_v37 }
 0x36f   :  { %722 = vrot.lane.b32.xlu1 %v626_v37, %s1445_s10  ;;  %1368 = vmatpush1.bf16.msk.msra.mxu0 %vm1823_vm12, %v620_v34 }
 0x370   :  { %v695_v38 = vpop.permute.xlu1 %694 }
 0x372   :  { %709 = vrot.lane.b32.xlu0 %v632_v39, %s1444_s9 }
 0x373   :  { %720 = vrot.lane.b32.xlu1 %v632_v39, %s1445_s10 }
 0x374   :  { %v697_v41 = vpop.permute.xlu1 %696 }
 0x375   :  { %v699_v42 = vsel %vm625_vm10, %v695_v38, %v697_v41 }
 0x376   :  { %v1838_v43 = vsel %vm634_vm11, %v699_v42, 0  ;;  %733 = vrot.lane.b32.xlu0 %v626_v37, %s1446_s11 }
 0x377   :  { %744 = vrot.lane.b32.xlu1 %v626_v37, %s1447_s12 }
 0x378   :  { %v1852_v48 = vpop.permute.xlu1 %692 }
 0x379   :  { %v1858_v49 = vsel %vm625_vm10, %v1852_v48, %v695_v38  ;;  %v702_v50 = vsel %vm625_vm10, 0, %v1852_v48 }
 0x37a   :  { %731 = vrot.lane.b32.xlu0 %v632_v39, %s1446_s11 }
 0x37b   :  { %742 = vrot.lane.b32.xlu1 %v632_v39, %s1447_s12 }
 0x37e   :  { %755 = vrot.lane.b32.xlu0 %v626_v37, %s1448_s13 }
 0x37f   :  { %766 = vrot.lane.b32.xlu1 %v626_v37, %s1449_s14 }
 0x382   :  { %753 = vrot.lane.b32.xlu0 %v632_v39, %s1448_s13 }
 0x383   :  { %764 = vrot.lane.b32.xlu1 %v632_v39, %s1449_s14 }
 0x386   :  { %777 = vrot.lane.b32.xlu0 %v626_v37, %s1450_s17 }
 0x387   :  { %713 = vrot.lane.b32.xlu1 %v636_v33, %s1444_s9 }
 0x38a   :  { %775 = vrot.lane.b32.xlu0 %v632_v39, %s1450_s17 }
 0x38b   :  { %788 = vrot.lane.b32.xlu1 %v626_v37, %s1451_s18 }
 0x38e   :  { %724 = vrot.lane.b32.xlu0 %v636_v33, %s1445_s10 }
 0x38f   :  { %735 = vrot.lane.b32.xlu1 %v636_v33, %s1446_s11 }
 0x392   :  { %897 = vrot.lane.b32.xlu0 %v1858_v49, %s1444_s9 }
 0x393   :  { %786 = vrot.lane.b32.xlu1 %v632_v39, %s1451_s18 }
 0x396   :  { %746 = vrot.lane.b32.xlu0 %v636_v33, %s1447_s12 }
 0x397   :  { %757 = vrot.lane.b32.xlu1 %v636_v33, %s1448_s13 }
 0x39a   :  { %895 = vrot.lane.b32.xlu0 %v702_v50, %s1444_s9 }
 0x39b   :  { %908 = vrot.lane.b32.xlu1 %v1858_v49, %s1445_s10 }
 0x39e   :  { %768 = vrot.lane.b32.xlu0 %v636_v33, %s1449_s14 }
 0x39f   :  { %779 = vrot.lane.b32.xlu1 %v636_v33, %s1450_s17 }
 0x3a2   :  { %919 = vrot.lane.b32.xlu0 %v1858_v49, %s1446_s11 }
 0x3a3   :  { %906 = vrot.lane.b32.xlu1 %v702_v50, %s1445_s10 }
 0x3a6   :  { %790 = vrot.lane.b32.xlu0 %v636_v33, %s1451_s18 }
 0x3a7   :  { %930 = vrot.lane.b32.xlu1 %v1858_v49, %s1447_s12 }
 0x3aa   :  { %917 = vrot.lane.b32.xlu0 %v702_v50, %s1446_s11 }
 0x3ab   :  { %899 = vrot.lane.b32.xlu1 %v1838_v43, %s1444_s9 }
 0x3ae   :  { %941 = vrot.lane.b32.xlu0 %v1858_v49, %s1448_s13 }
 0x3af   :  { %928 = vrot.lane.b32.xlu1 %v702_v50, %s1447_s12 }
 0x3b2   :  { %910 = vrot.lane.b32.xlu0 %v1838_v43, %s1445_s10 }
 0x3b3   :  { %921 = vrot.lane.b32.xlu1 %v1838_v43, %s1446_s11 }
 0x3b6   :  { %939 = vrot.lane.b32.xlu0 %v702_v50, %s1448_s13 }
 0x3b7   :  { %952 = vrot.lane.b32.xlu1 %v1858_v49, %s1449_s14 }
 0x3ba   :  { %932 = vrot.lane.b32.xlu0 %v1838_v43, %s1447_s12 }
 0x3bb   :  { %943 = vrot.lane.b32.xlu1 %v1838_v43, %s1448_s13 }
 0x3be   :  { %963 = vrot.lane.b32.xlu0 %v1858_v49, %s1450_s17 }
 0x3bf   :  { %950 = vrot.lane.b32.xlu1 %v702_v50, %s1449_s14 }
 0x3c2   :  { %954 = vrot.lane.b32.xlu0 %v1838_v43, %s1449_s14 }
 0x3c3   :  { %965 = vrot.lane.b32.xlu1 %v1838_v43, %s1450_s17 }
 0x3c6   :  { %961 = vrot.lane.b32.xlu0 %v702_v50, %s1450_s17 }
 0x3c7   :  { %974 = vrot.lane.b32.xlu1 %v1858_v49, %s1451_s18 }
 0x3ca   :  { %976 = vrot.lane.b32.xlu0 %v1838_v43, %s1451_s18 }
 0x3cb   :  { %972 = vrot.lane.b32.xlu1 %v702_v50, %s1451_s18 }
 0x3e0   :  { %v712_v54 = vpop.permute.xlu0 %711 }
 0x3e1   :  { %v723_v56 = vpop.permute.xlu1 %722 }
 0x3e4   :  { %v710_v57 = vpop.permute.xlu0 %709 }
 0x3e5   :  { %v721_v58 = vpop.permute.xlu1 %720  ;;  %v715_v47 = vsel %vm61_vm1, %v710_v57, %v712_v54 }
 0x3e6   :  { %v726_v12 = vsel %vm73_vm2, %v721_v58, %v723_v56 }
 0x3e8   :  { %v734_v59 = vpop.permute.xlu0 %733 }
 0x3e9   :  { %v745_v60 = vpop.permute.xlu1 %744 }
 0x3ec   :  { %v732_v62 = vpop.permute.xlu0 %731 }
 0x3ed   :  { %v743_v63 = vpop.permute.xlu1 %742  ;;  %v737_v15 = vsel %vm85_vm3, %v732_v62, %v734_v59 }
 0x3ee   :  { %v748_v16 = vsel %vm97_vm4, %v743_v63, %v745_v60 }
 0x3f0   :  { %v756_v0 = vpop.permute.xlu0 %755 }
 0x3f1   :  { %v767_v2 = vpop.permute.xlu1 %766 }
 0x3f4   :  { %v754_v4 = vpop.permute.xlu0 %753 }
 0x3f5   :  { %v765_v5 = vpop.permute.xlu1 %764  ;;  %v759_v36 = vsel %vm109_vm5, %v754_v4, %v756_v0 }
 0x3f6   :  { %v770_v40 = vsel %vm121_vm6, %v765_v5, %v767_v2 }
 0x3f8   :  { %v778_v6 = vpop.permute.xlu0 %777 }
 0x3f9   :  { %v714_v51 = vpop.permute.xlu1 %713 }
 0x3fa   :  { %855 = vmatpush1.bf16.msra.mxu1 %v714_v51  ;;  %v716_v55 = vsel %vm61_vm1, %v712_v54, %v714_v51 }
 0x3fb   :  { %811 = vmatprep.subr.bf16.mxu0 %v716_v55  ;;  %856 = vmatprep.subr.bf16.mxu1 %v1443_v3 }
 0x3fc   :  { %812 = vmatpush1.bf16.msra.mxu0 %v715_v47  ;;  %v776_v26 = vpop.permute.xlu0 %775 }
 0x3fd   :  { %v789_v7 = vpop.permute.xlu1 %788  ;;  %v781_v24 = vsel %vm133_vm7, %v776_v26, %v778_v6 }
 0x400   :  { %v725_v22 = vpop.permute.xlu0 %724 }
 0x401   :  { %v736_v9 = vpop.permute.xlu1 %735  ;;  %857 = vmatpush1.bf16.msra.mxu1 %v725_v22  ;;  %v727_v10 = vsel %vm73_vm2, %v723_v56, %v725_v22 }
 0x402   :  { %813 = vmatprep.subr.bf16.mxu0 %v727_v10  ;;  %858 = vmatprep.subr.bf16.mxu1 %v1443_v3  ;;  %v738_v8 = vsel %vm85_vm3, %v734_v59, %v736_v9 }
 0x403   :  { %814 = vmatpush1.bf16.msra.mxu0 %v726_v12 }
 0x404   :  { %v1924_v13 = vpop.permute.xlu0 %897  ;;  %815 = vmatprep.subr.bf16.mxu0 %v738_v8 }
 0x405   :  { %v787_v14 = vpop.permute.xlu1 %786  ;;  %859 = vmatpush1.bf16.msra.mxu1 %v736_v9 }
 0x406   :  { %860 = vmatprep.subr.bf16.mxu1 %v1443_v3  ;;  %v792_v32 = vsel %vm145_vm8, %v787_v14, %v789_v7 }
 0x407   :  { %816 = vmatpush1.bf16.msra.mxu0 %v737_v15 }
 0x408   :  { %v747_v1 = vpop.permute.xlu0 %746 }
 0x409   :  { %v758_v30 = vpop.permute.xlu1 %757  ;;  %861 = vmatpush1.bf16.msra.mxu1 %v747_v1  ;;  %v749_v11 = vsel %vm97_vm4, %v745_v60, %v747_v1 }
 0x40a   :  { %817 = vmatprep.subr.bf16.mxu0 %v749_v11  ;;  %862 = vmatprep.subr.bf16.mxu1 %v1443_v3  ;;  %v760_v52 = vsel %vm109_vm5, %v756_v0, %v758_v30 }
 0x40b   :  { %818 = vmatpush1.bf16.msra.mxu0 %v748_v16 }
 0x40c   :  { %v896_v61 = vpop.permute.xlu0 %895  ;;  %819 = vmatprep.subr.bf16.mxu0 %v760_v52 }
 0x40d   :  { %v909_v17 = vpop.permute.xlu1 %908  ;;  %863 = vmatpush1.bf16.msra.mxu1 %v758_v30  ;;  %v901_v41 = vsel %vm61_vm1, %v896_v61, %v1924_v13 }
 0x40e   :  { %864 = vmatprep.subr.bf16.mxu1 %v1443_v3 }
 0x40f   :  { %820 = vmatpush1.bf16.msra.mxu0 %v759_v36 }
 0x410   :  { %v769_v18 = vpop.permute.xlu0 %768 }
 0x411   :  { %v780_v19 = vpop.permute.xlu1 %779  ;;  %865 = vmatpush1.bf16.msra.mxu1 %v769_v18  ;;  %v771_v20 = vsel %vm121_vm6, %v767_v2, %v769_v18 }
 0x412   :  { %821 = vmatprep.subr.bf16.mxu0 %v771_v20  ;;  %866 = vmatprep.subr.bf16.mxu1 %v1443_v3  ;;  %v782_v21 = vsel %vm133_vm7, %v778_v6, %v780_v19 }
 0x413   :  { %822 = vmatpush1.bf16.msra.mxu0 %v770_v40 }
 0x414   :  { %v920_v27 = vpop.permute.xlu0 %919  ;;  %823 = vmatprep.subr.bf16.mxu0 %v782_v21 }
 0x415   :  { %v907_v23 = vpop.permute.xlu1 %906  ;;  %867 = vmatpush1.bf16.msra.mxu1 %v780_v19 }
 0x416   :  { %868 = vmatprep.subr.bf16.mxu1 %v1443_v3 }
 0x417   :  { %824 = vmatpush1.bf16.msra.mxu0 %v781_v24 }
 0x418   :  { %v791_v25 = vpop.permute.xlu0 %790 }
 0x419   :  { %v931_v29 = vpop.permute.xlu1 %930  ;;  %869 = vmatpush1.bf16.msra.mxu1 %v791_v25  ;;  %v793_v31 = vsel %vm145_vm8, %v789_v7, %v791_v25 }
 0x41a   :  { %825 = vmatprep.subr.bf16.mxu0 %v793_v31  ;;  %1026 = vmatprep.subr.bf16.mxu1 %v1443_v3 }
 0x41b   :  { %826 = vmatpush1.bf16.msra.mxu0 %v792_v32 }
 0x41c   :  { %v918_v33 = vpop.permute.xlu0 %917  ;;  %983 = vmatprep.subr.bf16.mxu0 %v1858_v49  ;;  %885 = vmatmul.mubr.bf16.vlgmr.msra.gmra.mrb[8].mxu1 %v1943_v28 }
 0x41d   :  { %v900_v34 = vpop.permute.xlu1 %899  ;;  %1027 = vmatpush1.bf16.msra.mxu1 %v1838_v43  ;;  %1374 = vmatprep.mubr.msk.bf16.mxu1 %vm160_vm0, %v1873_v53  ;;  %v923_v54 = vsel %vm85_vm3, %v918_v33, %v920_v27 }
 0x41e   :  { %842 = vmatmul.mubr.bf16.vlgmr.msra.gmra.mrb[8].mxu0 %v1943_v28  ;;  %1028 = vmatprep.subr.bf16.mxu1 %v1443_v3  ;;  %v902_v37 = vsel %vm61_vm1, %v1924_v13, %v900_v34 }
 0x41f   :  { %1372 = vmatpush1.bf16.msk.msra.mxu0 %vm1823_vm12, %v1852_v48  ;;  %1373 = vmatprep.mubr.msk.bf16.mxu0 %vm160_vm0, %v1873_v53  ;;  %v912_v48 = vsel %vm73_vm2, %v907_v23, %v909_v17 }
 0x420   :  { %v942_v38 = vpop.permute.xlu0 %941  ;;  %985 = vmatprep.subr.bf16.mxu0 %v902_v37 }
 0x421   :  { %v929_v39 = vpop.permute.xlu1 %928  ;;  %1029 = vmatpush1.bf16.msra.mxu1 %v900_v34 }
 0x422   :  { %1030 = vmatprep.subr.bf16.mxu1 %v1443_v3  ;;  %v934_v59 = vsel %vm97_vm4, %v929_v39, %v931_v29 }
 0x423   :  { %986 = vmatpush1.bf16.msra.mxu0 %v901_v41 }
 0x424   :  { %v911_v42 = vpop.permute.xlu0 %910 }
 0x425   :  { %v922_v43 = vpop.permute.xlu1 %921  ;;  %1031 = vmatpush1.bf16.msra.mxu1 %v911_v42  ;;  %v913_v35 = vsel %vm73_vm2, %v909_v17, %v911_v42 }
 0x426   :  { %987 = vmatprep.subr.bf16.mxu0 %v913_v35  ;;  %1032 = vmatprep.subr.bf16.mxu1 %v1443_v3  ;;  %v924_v49 = vsel %vm85_vm3, %v920_v27, %v922_v43 }
 0x427   :  { %988 = vmatpush1.bf16.msra.mxu0 %v912_v48 }
 0x428   :  { %v940_v50 = vpop.permute.xlu0 %939  ;;  %989 = vmatprep.subr.bf16.mxu0 %v924_v49 }
 0x429   :  { %v953_v53 = vpop.permute.xlu1 %952  ;;  %1033 = vmatpush1.bf16.msra.mxu1 %v922_v43  ;;  %v945_v0 = vsel %vm109_vm5, %v940_v50, %v942_v38 }
 0x42a   :  { %1034 = vmatprep.subr.bf16.mxu1 %v1443_v3 }
 0x42b   :  { %990 = vmatpush1.bf16.msra.mxu0 %v923_v54 }
 0x42c   :  { %v933_v56 = vpop.permute.xlu0 %932 }
 0x42d   :  { %v944_v57 = vpop.permute.xlu1 %943  ;;  %1035 = vmatpush1.bf16.msra.mxu1 %v933_v56  ;;  %v935_v58 = vsel %vm97_vm4, %v931_v29, %v933_v56 }
 0x42e   :  { %991 = vmatprep.subr.bf16.mxu0 %v935_v58  ;;  %1036 = vmatprep.subr.bf16.mxu1 %v1443_v3  ;;  %v946_v60 = vsel %vm109_vm5, %v942_v38, %v944_v57 }
 0x42f   :  { %992 = vmatpush1.bf16.msra.mxu0 %v934_v59 }
 0x430   :  { %v964_v62 = vpop.permute.xlu0 %963  ;;  %993 = vmatprep.subr.bf16.mxu0 %v946_v60 }
 0x431   :  { %v951_v63 = vpop.permute.xlu1 %950  ;;  %1037 = vmatpush1.bf16.msra.mxu1 %v944_v57 }
 0x432   :  { %1038 = vmatprep.subr.bf16.mxu1 %v1443_v3  ;;  %v956_v6 = vsel %vm121_vm6, %v951_v63, %v953_v53 }
 0x433   :  { %994 = vmatpush1.bf16.msra.mxu0 %v945_v0 }
 0x434   :  { %v955_v2 = vpop.permute.xlu0 %954 }
 0x435   :  { %v966_v4 = vpop.permute.xlu1 %965  ;;  %1039 = vmatpush1.bf16.msra.mxu1 %v955_v2  ;;  %v957_v5 = vsel %vm121_vm6, %v953_v53, %v955_v2 }
 0x436   :  { %995 = vmatprep.subr.bf16.mxu0 %v957_v5  ;;  %1040 = vmatprep.subr.bf16.mxu1 %v1443_v3  ;;  %v968_v51 = vsel %vm133_vm7, %v964_v62, %v966_v4 }
 0x437   :  { %996 = vmatpush1.bf16.msra.mxu0 %v956_v6 }
 0x438   :  { %v962_v55 = vpop.permute.xlu0 %961  ;;  %997 = vmatprep.subr.bf16.mxu0 %v968_v51 }
 0x439   :  { %v967_v47 = vsel %vm133_vm7, %v962_v55, %v964_v62  ;;  %v975_v26 = vpop.permute.xlu1 %974  ;;  %1041 = vmatpush1.bf16.msra.mxu1 %v966_v4 }
 0x43a   :  { %1042 = vmatprep.subr.bf16.mxu1 %v1443_v3 }
 0x43b   :  { %998 = vmatpush1.bf16.msra.mxu0 %v967_v47 }
 0x43c   :  { %v977_v7 = vpop.permute.xlu0 %976 }
 0x43d   :  { %v973_v22 = vpop.permute.xlu1 %972  ;;  %1043 = vmatpush1.bf16.msra.mxu1 %v977_v7  ;;  %v979_v9 = vsel %vm145_vm8, %v975_v26, %v977_v7 }
 0x43e   :  { %v978_v10 = vsel %vm145_vm8, %v973_v22, %v975_v26  ;;  %999 = vmatprep.subr.bf16.mxu0 %v979_v9 }
 0x43f   :  { %1000 = vmatpush1.bf16.msra.mxu0 %v978_v10 }
 0x440   :  { %1059 = vmatmul.mubr.bf16.vlgmr.msra.gmra.mrb[12].mxu1 %v1943_v28 }
 0x442   :  { %1016 = vmatmul.mubr.bf16.vlgmr.msra.gmra.mrb[12].mxu0 %v1943_v28 }
 0x4ef   :  { %v1987_v12 = vpop.f32.mrb[8].mxu1 }
 0x4f0   :  { %v1069_v8 = vmul.f32 %v1987_v12, %v1683_v44  ;;  %v1105_v3 = vmul.f32 %v1987_v12, %v1987_v12  ;;  %v888_v13 = vpop.f32.mrb[9].mxu1 }
 0x4f1   :  { %v1993_v14 = vpop.f32.mrb[8].mxu0  ;;  %v1995_v15 = vpop.f32.mrb[10].mxu1 }
 0x4f2   :  { %v1067_v1 = vmul.f32 %v1993_v14, %v1685_v45  ;;  %v1103_v30 = vmul.f32 %v1993_v14, %v1993_v14  ;;  %v1111_v11 = vmul.f32 %v1105_v3, %v1683_v44  ;;  %v2002_v16 = vpop.f32.mrb[9].mxu0  ;;  %v1072_v52 = vmul.f32 %v1995_v15, %v1683_v44  ;;  %v891_v61 = vpop.f32.mrb[11].mxu1 }
 0x4f3   :  { %v1068_v17 = vmul.f32 %v2002_v16, %v1687_v46  ;;  %v1104_v36 = vmul.f32 %v2002_v16, %v2002_v16  ;;  %v2010_v18 = vpop.f32.mrb[10].mxu0  ;;  %v1108_v19 = vmul.f32 %v1995_v15, %v1995_v15  ;;  %v1074_v23 = vsel %vm449_vm9, %v1069_v8, 0.0 }
 0x4f4   :  { %v1109_v20 = vmul.f32 %v1103_v30, %v1685_v45  ;;  %v1070_v40 = vmul.f32 %v2010_v18, %v1685_v45  ;;  %v1106_v21 = vmul.f32 %v2010_v18, %v2010_v18  ;;  %v2019_v27 = vpop.f32.mrb[11].mxu0  ;;  %v1079_v33 = vsel %vm449_vm9, %v1072_v52, 0.0 }
 0x4f5   :  { %v1073_v24 = vadd.f32 %v1068_v17, %v1067_v1  ;;  %v1110_v25 = vmul.f32 %v1104_v36, %v1687_v46  ;;  %v1114_v28 = vmul.f32 %v1108_v19, %v1683_v44  ;;  %v1071_v29 = vmul.f32 %v2019_v27, %v1687_v46 }
 0x4f6   :  { %v1112_v31 = vmul.f32 %v1106_v21, %v1685_v45  ;;  %v1107_v32 = vmul.f32 %v2019_v27, %v2019_v27  ;;  %v1116_v34 = vsel %vm449_vm9, %v1111_v11, 0.0 }
 0x4f7   :  { %v1078_v37 = vadd.f32 %v1071_v29, %v1070_v40  ;;  %v1075_v38 = vadd.f32 %v1074_v23, %v1073_v24  ;;  %v1115_v39 = vadd.f32 %v1110_v25, %v1109_v20  ;;  %v1121_v43 = vsel %vm449_vm9, %v1114_v28, 0.0  ;;  %v1433_v23 = vld [vmem:[%s2203_s0 + $0x28] sm:$0xff]  ;;  %v1434_v24 = vld [vmem:[%s2203_s0] sm:$0xff]  ;;  %v1435_v25 = vld [vmem:[%s2203_s0 + $0x38] sm:$0xff] }
 0x4f8   :  { %v1113_v41 = vmul.f32 %v1107_v32, %v1687_v46  ;;  %v1436_v28 = vld [vmem:[%s2203_s0 + $0x10] sm:$0xff]  ;;  %v1437_v29 = vld [vmem:[%s2203_s0 + $0x20] sm:$0xff] }
 0x4f9   :  { %1076 = vadd.xlane.f32.xlu0 %v1075_v38  ;;  %v1080_v42 = vadd.f32 %v1079_v33, %v1078_v37  ;;  %v1117_v35 = vadd.f32 %v1116_v34, %v1115_v39 }
 0x4fa   :  { %v1120_v48 = vadd.f32 %v1113_v41, %v1112_v31  ;;  %v1438_v31 = vld [vmem:[%s2203_s0 + $0x30] sm:$0xff] }
 0x4fb   :  { %1081 = vadd.xlane.f32.xlu1 %v1080_v42 }
 0x4fc   :  { %v1122_v49 = vadd.f32 %v1121_v43, %v1120_v48 }
 0x4fe   :  { %1123 = vadd.xlane.f32.xlu0 %v1122_v49 }
 0x4ff   :  { %1118 = vadd.xlane.f32.xlu1 %v1117_v35 }
 0x513   :  { %v2033_v50 = vpop.f32.mrb[12].mxu1 }
 0x514   :  { %v1087_v53 = vmul.f32 %v2033_v50, %v1683_v44  ;;  %v1129_v54 = vmul.f32 %v2033_v50, %v2033_v50  ;;  %v1062_v56 = vpop.f32.mrb[13].mxu1 }
 0x515   :  { %v2039_v57 = vpop.f32.mrb[12].mxu0  ;;  %v2041_v58 = vpop.f32.mrb[14].mxu1 }
 0x516   :  { %v1135_v59 = vmul.f32 %v1129_v54, %v1683_v44  ;;  %v1085_v60 = vmul.f32 %v2039_v57, %v1685_v45  ;;  %v1127_v62 = vmul.f32 %v2039_v57, %v2039_v57  ;;  %v2048_v63 = vpop.f32.mrb[13].mxu0  ;;  %v1065_v0 = vpop.f32.mrb[15].mxu1  ;;  %v1090_v5 = vmul.f32 %v2041_v58, %v1683_v44 }
 0x517   :  { %v1086_v2 = vmul.f32 %v2048_v63, %v1687_v46  ;;  %v1128_v4 = vmul.f32 %v2048_v63, %v2048_v63  ;;  %v1132_v6 = vmul.f32 %v2041_v58, %v2041_v58  ;;  %v2058_v51 = vpop.f32.mrb[14].mxu0  ;;  %v1092_v22 = vsel %vm449_vm9, %v1087_v53, 0.0 }
 0x518   :  { %v1133_v55 = vmul.f32 %v1127_v62, %v1685_v45  ;;  %v1088_v47 = vmul.f32 %v2058_v51, %v1685_v45  ;;  %v1130_v26 = vmul.f32 %v2058_v51, %v2058_v51  ;;  %v2065_v7 = vpop.f32.mrb[15].mxu0  ;;  %v1140_v1 = vsel %vm449_vm9, %v1135_v59, 0.0 }
 0x519   :  { %v1091_v9 = vadd.f32 %v1086_v2, %v1085_v60  ;;  %v1134_v10 = vmul.f32 %v1128_v4, %v1687_v46  ;;  %v1089_v8 = vmul.f32 %v2065_v7, %v1687_v46  ;;  %v1131_v13 = vmul.f32 %v2065_v7, %v2065_v7 }
 0x51a   :  { %v1136_v3 = vmul.f32 %v1130_v26, %v1685_v45  ;;  %v1138_v30 = vmul.f32 %v1132_v6, %v1683_v44  ;;  %v1097_v36 = vsel %vm449_vm9, %v1090_v5, 0.0  ;;  %v1431_v44 = vld [vmem:[%s2203_s0 + $0x8] sm:$0xff]  ;;  %v28_v6 = vld [vmem:[%s2208_s4] sm:$0xff]  ;;  %v30_v26 = vld [vmem:[%s2208_s4 + $0x10] sm:$0xff] }
 0x51b   :  { %v1096_v11 = vadd.f32 %v1089_v8, %v1088_v47  ;;  %v1093_v52 = vadd.f32 %v1092_v22, %v1091_v9  ;;  %v1139_v61 = vadd.f32 %v1134_v10, %v1133_v55  ;;  %v1137_v17 = vmul.f32 %v1131_v13, %v1687_v46  ;;  %v1432_v46 = vld [vmem:[%s2203_s0 + $0x18] sm:$0xff]  ;;  %v29_v9 = vld [vmem:[%s2208_s4 + $0x8] sm:$0xff] }
 0x51c   :  { %v1145_v45 = vsel %vm449_vm9, %v1138_v30, 0.0  ;;  %v31_v13 = vld [vmem:[%s2208_s4 + $0x18] sm:$0xff] }
 0x51d   :  { %1094 = vadd.xlane.f32.xlu0 %v1093_v52  ;;  %v1141_v19 = vadd.f32 %v1140_v1, %v1139_v61  ;;  %v1098_v20 = vadd.f32 %v1097_v36, %v1096_v11  ;;  %v1144_v40 = vadd.f32 %v1137_v17, %v1136_v3  ;;  %v1439_v11 = vld [vmem:[%s2203_s0 + $0x40] sm:$0xff]  ;;  %v1440_v52 = vld [vmem:[%s2203_s0 + $0x50] sm:$0xff]  ;;  %v1441_v61 = vld [vmem:[%s2203_s0 + $0x48] sm:$0xff] }
 0x51e   :  { %v1442_v17 = vld [vmem:[%s2203_s0 + $0x58] sm:$0xff] }
 0x51f   :  { %1142 = vadd.xlane.f32.xlu1 %v1141_v19  ;;  %v1146_v21 = vadd.f32 %v1145_v45, %v1144_v40 }
 0x521   :  { %1099 = vadd.xlane.f32.xlu0 %v1098_v20 }
 0x525   :  { %1147 = vadd.xlane.f32.xlu0 %v1146_v21 }
 0x530   :  { %1209 = vrot.lane.b32.xlu1 %v1431_v44, %s1447_s12 }
 0x534   :  { %1213 = vrot.lane.b32.xlu1 %v1432_v46, %s1447_s12 }
 0x538   :  { %1217 = vrot.lane.b32.xlu1 %v1433_v23, %s1447_s12 }
 0x53b   :  { %1207 = vrot.lane.b32.xlu0 %v1434_v24, %s1447_s12 }
 0x53c   :  { %1286 = vrot.lane.b32.xlu1 %v1435_v25, %s1447_s12 }
 0x53f   :  { %1211 = vrot.lane.b32.xlu0 %v1436_v28, %s1447_s12 }
 0x543   :  { %1215 = vrot.lane.b32.xlu0 %v1437_v29, %s1447_s12 }
 0x547   :  { %1284 = vrot.lane.b32.xlu0 %v1438_v31, %s1447_s12 }
 0x586   :  { %v1077_v32 = vpop.xlane.xlu0 %1076 }
 0x588   :  { %v1082_v33 = vpop.xlane.xlu1 %1081 }
 0x58b   :  { %v1124_v34 = vpop.xlane.xlu0 %1123 }
 0x58c   :  { %v1119_v37 = vpop.xlane.xlu1 %1118 }
 0x5aa   :  { %v1095_v38 = vpop.xlane.xlu0 %1094 }
 0x5ab   :  { %v1101_v39 = vadd.f32 %v1095_v38, %v1077_v32 }
 0x5ac   :  { %v1143_v41 = vpop.xlane.xlu1 %1142 }
 0x5ad   :  { %v1151_v42 = vmul.f32 0.001953125, %v1101_v39  ;;  %v1149_v43 = vadd.f32 %v1143_v41, %v1119_v37 }
 0x5ae   :  { %v1100_v35 = vpop.xlane.xlu0 %1099 }
 0x5af   :  { %v1155_v48 = vmul.f32 %v1151_v42, %v1151_v42  ;;  %v1153_v49 = vmul.f32 0.001953125, %v1149_v43  ;;  %v1102_v53 = vadd.f32 %v1100_v35, %v1082_v33 }
 0x5b0   :  { %v1210_v36 = vpop.permute.xlu1 %1209 }
 0x5b1   :  { %v1157_v54 = vsub.f32 %v1153_v49, %v1155_v48  ;;  %v1152_v56 = vmul.f32 0.001953125, %v1102_v53 }
 0x5b2   :  { %v1148_v59 = vpop.xlane.xlu0 %1147 }
 0x5b3   :  { %v1159_v60 = vadd.f32 1e-05, %v1157_v54  ;;  %v1150_v62 = vadd.f32 %v1148_v59, %v1124_v34  ;;  %v1156_v0 = vmul.f32 %v1152_v56, %v1152_v56 }
 0x5b4   :  { %v1214_v19 = vpop.permute.xlu1 %1213 }
 0x5b5   :  { %1427 = vrsqrt.f32 %v1159_v60  ;;  %v1154_v2 = vmul.f32 0.001953125, %v1150_v62 }
 0x5b6   :  { %v1208_v20 = vpop.permute.xlu0 %1207 }
 0x5b7   :  { %v1158_v4 = vsub.f32 %v1154_v2, %v1156_v0  ;;  %v1220_v31 = vsel %vm97_vm4, %v1208_v20, %v1210_v36 }
 0x5b8   :  { %v2139_v40 = vpop.permute.xlu1 %1217 }
 0x5b9   :  { %v1160_v5 = vadd.f32 1e-05, %v1158_v4 }
 0x5ba   :  { %v1212_v45 = vpop.permute.xlu0 %1211 }
 0x5bb   :  { %1429 = vrsqrt.f32 %v1160_v5  ;;  %v1221_v32 = vsel %vm97_vm4, %v1210_v36, %v1212_v45 }
 0x5bc   :  { %v1287_v21 = vpop.permute.xlu1 %1286 }
 0x5be   :  { %v1216_v44 = vpop.permute.xlu0 %1215 }
 0x5bf   :  { %v1428_v55 = vpop.eup %1427  ;;  %v1222_v33 = vsel %vm97_vm4, %v1214_v19, %v1216_v44 }
 0x5c0   :  { %v1163_v47 = vmul.f32 %v1428_v55, %v28_v6 }
 0x5c2   :  { %1171 = vperm.xlu1 %1415, %v1163_v47   ;;  %v1165_v22 = vmul.f32 %v1163_v47, %v1151_v42  ;;  %v1285_v23 = vpop.permute.xlu0 %1284 }
 0x5c4   :  { %v1167_v10 = vsub.f32 %v30_v26, %v1165_v22 }
 0x5c5   :  { %v1430_v8 = vpop.eup %1429 }
 0x5c6   :  { %1187 = vperm.xlu1 %1415, %v1167_v10   ;;  %v1164_v3 = vmul.f32 %v1430_v8, %v29_v9 }
 0x5c8   :  { %1176 = vperm.xlu0 %1416, %v1164_v3   ;;  %v1166_v1 = vmul.f32 %v1164_v3, %v1152_v56 }
 0x5ca   :  { %v1168_v30 = vsub.f32 %v31_v13, %v1166_v1 }
 0x5cc   :  { %1192 = vperm.xlu1 %1415, %v1168_v30   ;;  %1288 = vrot.lane.b32.xlu0 %v1439_v11, %s1447_s12 }
 0x5d0   :  { %1292 = vrot.lane.b32.xlu0 %v1440_v52, %s1447_s12  ;;  %1290 = vrot.lane.b32.xlu1 %v1441_v61, %s1447_s12 }
 0x5d4   :  { %1294 = vrot.lane.b32.xlu1 %v1442_v17, %s1447_s12 }
 0x641   :  { %v1172_v46 = vpop.permute.xlu1 %1171 }
 0x642   :  { %v1179_v24 = vmul.f32 %v1172_v46, %v1993_v14  ;;  %v1180_v25 = vmul.f32 %v1172_v46, %v2002_v16  ;;  %v1181_v28 = vmul.f32 %v1172_v46, %v1987_v12  ;;  %v1266_v29 = vmul.f32 %v1172_v46, %v2039_v57 }
 0x643   :  { %v1223_v14 = vsel %vm97_vm4, %v1216_v44, %v2139_v40  ;;  %v1296_v16 = vsel %vm97_vm4, %v1285_v23, %v1287_v21  ;;  %v1267_v12 = vmul.f32 %v1172_v46, %v2048_v63  ;;  %v1268_v57 = vmul.f32 %v1172_v46, %v2033_v50 }
 0x645   :  { %v1188_v34 = vpop.permute.xlu1 %1187 }
 0x646   :  { %v1195_v37 = vadd.f32 %v1188_v34, %v1179_v24  ;;  %v1196_v38 = vadd.f32 %v1188_v34, %v1180_v25  ;;  %v1197_v39 = vadd.f32 %v1188_v34, %v1181_v28  ;;  %v1272_v41 = vadd.f32 %v1266_v29, %v1188_v34 }
 0x647   :  { %v1177_v42 = vpop.permute.xlu0 %1176  ;;  %v1273_v56 = vadd.f32 %v1267_v12, %v1188_v34  ;;  %v1274_v59 = vadd.f32 %v1268_v57, %v1188_v34 }
 0x648   :  { %v1230_v43 = vadd.f32 %v1220_v31, %v1195_v37  ;;  %v1231_v35 = vadd.f32 %v1221_v32, %v1196_v38  ;;  %v1232_v48 = vadd.f32 %v1212_v45, %v1197_v39  ;;  %v1306_v49 = vadd.f32 %v1296_v16, %v1272_v41 }
 0x649   :  { %v1182_v53 = vmul.f32 %v1177_v42, %v2010_v18  ;;  %v1183_v54 = vmul.f32 %v1177_v42, %v2019_v27  ;;  %v1184_v4 = vmul.f32 %v1177_v42, %v1995_v15  ;;  %v1269_v50 = vmul.f32 %v1177_v42, %v2058_v51 }
 0x64a   :  { %v1236_v60 = vmax.f32 %v1230_v43, 0.0  ;;  %v1237_v62 = vmax.f32 %v1231_v35, 0.0  ;;  %v1238_v0 = vmax.f32 %v1232_v48, 0.0  ;;  %v1312_v2 = vmax.f32 %v1306_v49, 0.0 }
 0x64b   :  { %v1289_v5 = vpop.permute.xlu0 %1288  ;;  %v1193_v63 = vpop.permute.xlu1 %1192  ;;  %v1270_v6 = vmul.f32 %v1177_v42, %v2065_v7  ;;  %v1271_v55 = vmul.f32 %v1177_v42, %v2041_v58 }
 0x64c   :  { %v1242_v47 = vmin.f32 %v1236_v60, 1.0  ;;  %v1243_v18 = vmin.f32 %v1237_v62, 1.0  ;;  %v1244_v26 = vmin.f32 %v1238_v0, 1.0  ;;  %v1318_v27 = vmin.f32 %v1312_v2, 1.0 }
 0x64d   :  { %v1297_v22 = vsel %vm97_vm4, %v1287_v21, %v1289_v5  ;;  %v1308_v9 = vadd.f32 %v1289_v5, %v1274_v59  ;;  %v1198_v10 = vadd.f32 %v1193_v63, %v1182_v53  ;;  %v1199_v8 = vadd.f32 %v1193_v63, %v1183_v54 }
 0x64e   :  { %v1248_v3 = vmul.f32 15.0, %v1242_v47  ;;  %v1249_v13 = vmul.f32 15.0, %v1243_v18  ;;  %v1250_v15 = vmul.f32 15.0, %v1244_v26  ;;  %v1324_v1 = vmul.f32 15.0, %v1318_v27 }
 0x64f   :  { %v1307_v30 = vadd.f32 %v1297_v22, %v1273_v56  ;;  %v1314_v11 = vmax.f32 %v1308_v9, 0.0  ;;  %v1200_v51 = vadd.f32 %v1193_v63, %v1184_v4  ;;  %v1233_v52 = vadd.f32 %v1222_v33, %v1198_v10  ;;  %v1291_v7 = vpop.permute.xlu1 %1290  ;;  %v1293_v44 = vpop.permute.xlu0 %1292 }
 0x650   :  { %v1393_v61 = vround.rtne.f32 %v1248_v3  ;;  %v1394_v58 = vround.rtne.f32 %v1249_v13  ;;  %v1395_v17 = vround.rtne.f32 %v1250_v15  ;;  %v1399_v36 = vround.rtne.f32 %v1324_v1 }
 0x651   :  { %v1313_v19 = vmax.f32 %v1307_v30, 0.0  ;;  %v1320_v20 = vmin.f32 %v1314_v11, 1.0  ;;  %v1234_v45 = vadd.f32 %v1223_v14, %v1199_v8  ;;  %v1235_v21 = vadd.f32 %v2139_v40, %v1200_v51 }
 0x652   :  { %v1260_v46 = vmul.f32 0.06666667, %v1393_v61  ;;  %v1261_v23 = vmul.f32 0.06666667, %v1394_v58  ;;  %v1262_v24 = vmul.f32 0.06666667, %v1395_v17  ;;  %v1275_v25 = vadd.f32 %v1269_v50, %v1193_v63 }
 0x653   :  { %v1336_v28 = vmul.f32 0.06666667, %v1399_v36  ;;  %v1319_v29 = vmin.f32 %v1313_v19, 1.0  ;;  %v1326_v31 = vmul.f32 15.0, %v1320_v20  ;;  %v1239_v32 = vmax.f32 %v1233_v52, 0.0  ;;  %v1295_v33 = vpop.permute.xlu1 %1294 }
 0x654   :  { %1342 = vst [vmem:[%s2209_s6] sm:$0xff] %v1260_v46  ;;  %1343 = vst [vmem:[%s2209_s6 + $0x8] sm:$0xff] %v1261_v23  ;;  %v1240_v40 = vmax.f32 %v1234_v45, 0.0  ;;  %v1241_v34 = vmax.f32 %v1235_v21, 0.0  ;;  %v1298_v37 = vsel %vm97_vm4, %v1291_v7, %v1293_v44  ;;  %v1276_v38 = vadd.f32 %v1270_v6, %v1193_v63 }
 0x655   :  { %1344 = vst.msk [vmem:[%s2209_s6 + $0x10] sm:$0xff] %vm449_vm9, %v1262_v24  ;;  %1375 = vst [vmem:[%s2209_s6 + $0x30] sm:$0xff] %v1336_v28  ;;  %v1325_v39 = vmul.f32 15.0, %v1319_v29  ;;  %v1401_v41 = vround.rtne.f32 %v1326_v31  ;;  %v1245_v14 = vmin.f32 %v1239_v32, 1.0  ;;  %v1309_v16 = vadd.f32 %v1298_v37, %v1275_v25 }
 0x656   :  { %v1246_v42 = vmin.f32 %v1240_v40, 1.0  ;;  %v1247_v12 = vmin.f32 %v1241_v34, 1.0  ;;  %v1277_v57 = vadd.f32 %v1271_v55, %v1193_v63  ;;  %v1299_v43 = vsel %vm97_vm4, %v1293_v44, %v1295_v33 }
 0x657   :  { %v1400_v35 = vround.rtne.f32 %v1325_v39  ;;  %v1338_v48 = vmul.f32 0.06666667, %v1401_v41  ;;  %v1251_v49 = vmul.f32 15.0, %v1245_v14  ;;  %v1315_v53 = vmax.f32 %v1309_v16, 0.0 }
 0x658   :  { %v1252_v54 = vmul.f32 15.0, %v1246_v42  ;;  %v1253_v56 = vmul.f32 15.0, %v1247_v12  ;;  %v1310_v59 = vadd.f32 %v1299_v43, %v1276_v38  ;;  %v1311_v60 = vadd.f32 %v1295_v33, %v1277_v57 }
 0x659   :  { %v1337_v62 = vmul.f32 0.06666667, %v1400_v35  ;;  %1377 = vst.msk [vmem:[%s2209_s6 + $0x40] sm:$0xff] %vm449_vm9, %v1338_v48  ;;  %v1396_v0 = vround.rtne.f32 %v1251_v49  ;;  %v1321_v2 = vmin.f32 %v1315_v53, 1.0 }
 0x65a   :  { %v1397_v4 = vround.rtne.f32 %v1252_v54  ;;  %v1398_v5 = vround.rtne.f32 %v1253_v56  ;;  %v1316_v63 = vmax.f32 %v1310_v59, 0.0  ;;  %v1317_v50 = vmax.f32 %v1311_v60, 0.0 }
 0x65b   :  { %1376 = vst [vmem:[%s2209_s6 + $0x38] sm:$0xff] %v1337_v62  ;;  %v1263_v6 = vmul.f32 0.06666667, %v1396_v0  ;;  %v1327_v55 = vmul.f32 15.0, %v1321_v2 }
 0x65c   :  { %v1264_v47 = vmul.f32 0.06666667, %v1397_v4  ;;  %v1265_v18 = vmul.f32 0.06666667, %v1398_v5  ;;  %v1322_v26 = vmin.f32 %v1316_v63, 1.0  ;;  %v1323_v27 = vmin.f32 %v1317_v50, 1.0 }
 0x65d   :  { %1345 = vst [vmem:[%s2209_s6 + $0x18] sm:$0xff] %v1263_v6  ;;  %v1402_v22 = vround.rtne.f32 %v1327_v55 }
 0x65e   :  { %1346 = vst [vmem:[%s2209_s6 + $0x20] sm:$0xff] %v1264_v47  ;;  %1347 = vst.msk [vmem:[%s2209_s6 + $0x28] sm:$0xff] %vm449_vm9, %v1265_v18  ;;  %v1328_v9 = vmul.f32 15.0, %v1322_v26  ;;  %v1329_v10 = vmul.f32 15.0, %v1323_v27 }
 0x65f   :  { %v1339_v8 = vmul.f32 0.06666667, %v1402_v22 }
 0x660   :  { %v1403_v3 = vround.rtne.f32 %v1328_v9  ;;  %v1404_v13 = vround.rtne.f32 %v1329_v10 }
 0x661   :  { %1378 = vst [vmem:[%s2209_s6 + $0x48] sm:$0xff] %v1339_v8 }
 0x662   :  { %v1340_v15 = vmul.f32 0.06666667, %v1403_v3  ;;  %v1341_v1 = vmul.f32 0.06666667, %v1404_v13 }
 0x664   :  { %1379 = vst [vmem:[%s2209_s6 + $0x50] sm:$0xff] %v1340_v15  ;;  %1380 = vst.msk [vmem:[%s2209_s6 + $0x58] sm:$0xff] %vm449_vm9, %v1341_v1 }

</bundles_post_ra>
